<compile_context>
chip_gen: v7x
topology: tpu7x:2x2x1
jax: 0.10.0
libtpu: 0.0.40
codegen_flags: <defaults>
</compile_context>

<pallas_src>
import math
import functools

import jax
import jax.numpy as jnp
from jax.experimental import pallas as pl
from jax.experimental.pallas import tpu as pltpu


# ----------------------------------------------------------------------------
# SimVP helper
# ----------------------------------------------------------------------------

def sampling_generator(N, reverse=False):
    samplings = [False, True] * (N // 2)
    if reverse:
        return list(reversed(samplings[:N]))
    return samplings[:N]


# ----------------------------------------------------------------------------
# Fused ConvSC kernel:  Conv2d(k, stride, pad=k//2) + GroupNorm(2) + SiLU
# ----------------------------------------------------------------------------

def _convsc_kernel(x_ref, w_ref, prm_ref, o_ref, *,
                   taps, groups, Wq, Wo, Sw, n_valid, eps):
    # x_ref  : [1, P, Cin, L]   bf16  padded + stride-parity-deinterleaved planes
    # w_ref  : [T, Cout, Cin]   bf16  per-tap weight matrices
    # prm_ref: [Cout, 3]        f32   (bias, gamma, beta)
    # o_ref  : [1, Cout, Sp]    bf16  lane-dense "wide" output; only columns with
    #                                 (t < Sw) and (t % Wq < Wo) are real outputs
    Sp = o_ref.shape[2]
    Cout = w_ref.shape[1]
    Cg = Cout // groups

    # Conv as accumulation of kh*kw tap-GEMMs over statically shifted windows
    # (in-kernel im2col: the shifted views are plain lane slices of the flat
    # planes already resident in VMEM).
    pidx0, off0 = taps[0]
    acc = jnp.dot(w_ref[0], x_ref[0, pidx0, :, off0:off0 + Sp],
                  preferred_element_type=jnp.float32)
    for t in range(1, len(taps)):
        pidx, off = taps[t]
        acc = acc + jnp.dot(w_ref[t], x_ref[0, pidx, :, off:off + Sp],
                            preferred_element_type=jnp.float32)

    prm = prm_ref[...]                                      # [Cout, 3]
    acc = acc + prm[:, 0:1]                                 # conv bias

    # Validity mask for the wide/padded spatial layout.
    flat = jax.lax.broadcasted_iota(jnp.int32, (1, Sp), 1)
    valid = jnp.logical_and(flat < Sw, (flat % Wq) < Wo)    # [1, Sp]
    n = jnp.float32(n_valid)

    # GroupNorm(groups) + affine + SiLU, one contiguous channel half per group.
    for g in range(groups):
        a = acc[g * Cg:(g + 1) * Cg, :]
        am = jnp.where(valid, a, 0.0)
        s1 = jnp.sum(am, keepdims=True)                     # independent reductions,
        s2 = jnp.sum(am * am, keepdims=True)                # single pass over the slab
        mean = s1 / n
        var = jnp.maximum(s2 / n - mean * mean, 0.0)        # biased var (PyTorch GN)
        y = (a - mean) * jax.lax.rsqrt(var + eps)
        y = y * prm[g * Cg:(g + 1) * Cg, 1:2] + prm[g * Cg:(g + 1) * Cg, 2:3]
        o_ref[0, g * Cg:(g + 1) * Cg, :] = (y * jax.nn.sigmoid(y)).astype(o_ref.dtype)


def convsc_pallas(x, w, b, gamma, beta, *, stride, groups=2, eps=1e-5):
    """One ConvSC block. x: [B,Cin,H,W], w: [Cout,Cin,kh,kw]. Returns bf16."""
    B, Cin, H, W = x.shape
    Cout, Cin_w, kh, kw = w.shape
    assert Cin_w == Cin and Cout % groups == 0
    s = stride
    p = kh // 2
    Ho = (H + 2 * p - kh) // s + 1
    Wo = (W + 2 * p - kw) // s + 1
    Hp, Wp = H + 2 * p, W + 2 * p
    Hq, Wq = -(-Hp // s), -(-Wp // s)            # stride-parity plane extents
    Sw = Ho * Wq                                 # wide flat spatial extent
    Sp = ((Sw + 127) // 128) * 128               # lane-dense output width (>=128)
    P, T = s * s, kh * kw

    # Per-tap (parity plane, flat offset) map; bounds checks for the wide trick.
    taps = tuple(((i % s) * s + (j % s), (i // s) * Wq + (j // s))
                 for i in range(kh) for j in range(kw))
    max_off = max(off for _, off in taps)
    assert Ho - 1 + (kh - 1) // s < Hq and Wo - 1 + (kw - 1) // s < Wq
    L = max_off + Sp                             # flat plane length incl. read slack
    assert L >= Hq * Wq

    # Layout glue in XLA (cheap, ~1x activation bytes; NOT a kh*kw expansion):
    # cast bf16, pad channels to a multiple of 8, spatial halo pad, split into
    # s*s stride-parity planes, flatten spatial, pad flat tail with zeros.
    Cin_p = -(-Cin // 8) * 8
    xb = x.astype(jnp.bfloat16)
    if Cin_p != Cin:
        xb = jnp.pad(xb, ((0, 0), (0, Cin_p - Cin), (0, 0), (0, 0)))
    xp = jnp.pad(xb, ((0, 0), (0, 0), (p, p), (p, p)))
    planes = []
    for r in range(s):
        for c in range(s):
            pr = xp[:, :, r::s, c::s]
            pr = jnp.pad(pr, ((0, 0), (0, 0),
                              (0, Hq - pr.shape[2]), (0, Wq - pr.shape[3])))
            planes.append(pr.reshape(B, Cin_p, Hq * Wq))
    xplanes = jnp.stack(planes, axis=1)                              # [B,P,Cin_p,Hq*Wq]
    xplanes = jnp.pad(xplanes, ((0, 0), (0, 0), (0, 0), (0, L - Hq * Wq)))

    w_p = jnp.pad(w, ((0, 0), (0, Cin_p - Cin), (0, 0), (0, 0)))
    w_taps = jnp.transpose(w_p, (2, 3, 0, 1)).reshape(T, Cout, Cin_p)
    w_taps = w_taps.astype(jnp.bfloat16)                             # [T,Cout,Cin_p]
    prm = jnp.stack([b, gamma, beta], axis=-1).astype(jnp.float32)   # [Cout,3]

    # VMEM budget: double-buffered I/O blocks + f32 accumulator/epilogue temps.
    blk_bytes = (2 * (P * Cin_p * L * 2 + T * Cout * Cin_p * 2 + Cout * 3 * 4)
                 + 2 * (Cout * Sp * 2) + 4 * (Cout * Sp * 4))
    try:
        vmem_cap = int(pltpu.get_tpu_info().vmem_capacity_bytes)
    except Exception:
        vmem_cap = 64 * 1024 * 1024              # conservative (v7x physical VMEM)
    vmem_limit = int(min(max(2 * blk_bytes, 16 * 1024 * 1024), 0.75 * vmem_cap))
    if blk_bytes > vmem_limit:
        # TODO(synk): spatial tiling + accumulated GN stats needed at this size.
        raise ValueError(
            f"ConvSC working set ({blk_bytes} B) exceeds VMEM budget ({vmem_limit} B).")

    out = pl.pallas_call(
        functools.partial(_convsc_kernel, taps=taps, groups=groups,
                          Wq=Wq, Wo=Wo, Sw=Sw, n_valid=(Cout // groups) * Ho * Wo,
                          eps=eps),
        out_shape=jax.ShapeDtypeStruct((B, Cout, Sp), jnp.bfloat16),
        grid=(B,),
        in_specs=[
            pl.BlockSpec((1, P, Cin_p, L), lambda bb: (bb, 0, 0, 0)),
            pl.BlockSpec((T, Cout, Cin_p), lambda bb: (0, 0, 0)),
            pl.BlockSpec((Cout, 3), lambda bb: (0, 0)),
        ],
        out_specs=pl.BlockSpec((1, Cout, Sp), lambda bb: (bb, 0, 0)),
        compiler_params=pltpu.CompilerParams(
            dimension_semantics=("parallel",),
            vmem_limit_bytes=vmem_limit,
        ),
    )(xplanes, w_taps, prm)

    # Drop lane padding and the Wq - Wo garbage columns of the wide layout.
    out = out[:, :, :Sw].reshape(B, Cout, Ho, Wq)[:, :, :, :Wo]
    return out


# ----------------------------------------------------------------------------
# Encoder forward (faithful to the reference: returns only `latent`)
# ----------------------------------------------------------------------------

def encoder_forward(params, x):
    samplings = sampling_generator(len(params))
    latent = x
    for blk, down in zip(params, samplings):
        latent = convsc_pallas(latent, blk["w"], blk["b"], blk["gamma"], blk["beta"],
                               stride=2 if down else 1)
    return latent


# ----------------------------------------------------------------------------
# Parameter init + pure-JAX reference
# ----------------------------------------------------------------------------

def init_encoder_params(key, C_in, C_hid, N_S, spatio_kernel):
    n_blocks = len(sampling_generator(N_S))      # matches nn.Sequential construction
    params = []
    cin = C_in
    for kblk in jax.random.split(key, n_blocks):
        k1, k2 = jax.random.split(kblk)
        fan_in = cin * spatio_kernel * spatio_kernel
        params.append(dict(
            w=jax.random.normal(k1, (C_hid, cin, spatio_kernel, spatio_kernel),
                                jnp.float32) / math.sqrt(fan_in),
            b=jax.random.normal(k2, (C_hid,), jnp.float32) * 0.01,
            gamma=jnp.ones((C_hid,), jnp.float32),
            beta=jnp.zeros((C_hid,), jnp.float32),
        ))
        cin = C_hid
    return params


def encoder_reference(params, x, groups=2, eps=1e-5):
    samplings = sampling_generator(len(params))
    latent = x
    for blk, down in zip(params, samplings):
        stride = 2 if down else 1
        k = blk["w"].shape[-1]
        pad = k // 2
        y = jax.lax.conv_general_dilated(
            latent, blk["w"], window_strides=(stride, stride),
            padding=[(pad, pad), (pad, pad)],
            dimension_numbers=("NCHW", "OIHW", "NCHW"))
        y = y + blk["b"][None, :, None, None]
        B, C, H, W = y.shape
        yg = y.reshape(B, groups, C // groups, H, W)
        m = jnp.mean(yg, axis=(2, 3, 4), keepdims=True)
        v = jnp.mean((yg - m) ** 2, axis=(2, 3, 4), keepdims=True)
        yn = ((yg - m) / jnp.sqrt(v + eps)).reshape(B, C, H, W)
        yn = yn * blk["gamma"][None, :, None, None] + blk["beta"][None, :, None, None]
        latent = yn * jax.nn.sigmoid(yn)
    return latent


if __name__ == "__main__":
    key = jax.random.PRNGKey(0)
    kp, kx = jax.random.split(key)

    B, C_in, H, W = 2, 7, 16, 16
    C_hid, N_S, spatio_kernel = 32, 2, 3

    params = init_encoder_params(kp, C_in, C_hid, N_S, spatio_kernel)
    x = jax.random.normal(kx, (B, C_in, H, W), jnp.float32)

    fwd = jax.jit(encoder_forward)
    latent = jax.block_until_ready(fwd(params, x))
    assert latent.shape == (B, C_hid, H // 2, W // 2), latent.shape
    latent_f32 = latent.astype(jnp.float32)
    assert bool(jnp.all(jnp.isfinite(latent_f32)))

    ref = jax.block_until_ready(encoder_reference(params, x))
    max_err = float(jnp.max(jnp.abs(latent_f32 - ref)))
    mean_err = float(jnp.mean(jnp.abs(latent_f32 - ref)))
    # bf16 GEMM operands + bf16 inter-layer activations vs f32 reference.
    assert max_err < 1.5e-1 and mean_err < 2e-2, (max_err, mean_err)
    print("KERNEL_OK")
</pallas_src>

<mosaic_0001>
module attributes {stable_mosaic.version = 11 : i64} {
  func.func @_convsc_kernel(%arg0: i32, %arg1: memref<1x1x8x422xbf16, #tpu.memory_space<vmem>>, %arg2: memref<9x32x8xbf16, #tpu.memory_space<vmem>>, %arg3: memref<32x3xf32, #tpu.memory_space<vmem>>, %arg4: memref<1x32x384xbf16, #tpu.memory_space<vmem>>) attributes {dimension_semantics = [#tpu.dimension_semantics<parallel>], iteration_bounds = array<i64: 2>, scalar_prefetch = 0 : i64, scratch_operands = 0 : i64, tpu.core_type = #tpu.core_type<tc>, window_params = [{transform_indices = @transform_0, window_bounds = array<i64: 1, 1, 8, 422>}, {pipeline_mode = #tpu.pipeline_mode<synchronous>, transform_indices = @transform_1, window_bounds = array<i64: 9, 32, 8>}, {pipeline_mode = #tpu.pipeline_mode<synchronous>, transform_indices = @transform_2, window_bounds = array<i64: 32, 3>}, {transform_indices = @transform_3, window_bounds = array<i64: 1, 32, 384>}]} {
    %c0 = arith.constant 0 : index
    %c0_0 = arith.constant 0 : index
    %c0_1 = arith.constant 0 : index
    %0 = vector.load %arg2[%c0, %c0_0, %c0_1] : memref<9x32x8xbf16, #tpu.memory_space<vmem>>, vector<1x32x8xbf16>
    %1 = vector.shape_cast %0 : vector<1x32x8xbf16> to vector<32x8xbf16>
    %c0_2 = arith.constant 0 : index
    %c0_3 = arith.constant 0 : index
    %c0_4 = arith.constant 0 : index
    %c0_5 = arith.constant 0 : index
    %2 = vector.load %arg1[%c0_2, %c0_3, %c0_4, %c0_5] : memref<1x1x8x422xbf16, #tpu.memory_space<vmem>>, vector<1x1x8x384xbf16>
    %3 = vector.shape_cast %2 : vector<1x1x8x384xbf16> to vector<8x384xbf16>
    %cst = arith.constant dense<0.000000e+00> : vector<32x384xf32>
    %4 = tpu.matmul %1, %3, %cst {dimension_numbers = #tpu.dot_dimension_numbers<[1], [0], [0], [1], [0, 0, 1, 1], [], []>} : vector<32x8xbf16>, vector<8x384xbf16>, vector<32x384xf32> -> vector<32x384xf32>
    %c1 = arith.constant 1 : index
    %c0_6 = arith.constant 0 : index
    %c0_7 = arith.constant 0 : index
    %5 = vector.load %arg2[%c1, %c0_6, %c0_7] : memref<9x32x8xbf16, #tpu.memory_space<vmem>>, vector<1x32x8xbf16>
    %6 = vector.shape_cast %5 : vector<1x32x8xbf16> to vector<32x8xbf16>
    %c0_8 = arith.constant 0 : index
    %c0_9 = arith.constant 0 : index
    %c0_10 = arith.constant 0 : index
    %c1_11 = arith.constant 1 : index
    %7 = vector.load %arg1[%c0_8, %c0_9, %c0_10, %c1_11] : memref<1x1x8x422xbf16, #tpu.memory_space<vmem>>, vector<1x1x8x384xbf16>
    %8 = vector.shape_cast %7 : vector<1x1x8x384xbf16> to vector<8x384xbf16>
    %cst_12 = arith.constant dense<0.000000e+00> : vector<32x384xf32>
    %9 = tpu.matmul %6, %8, %cst_12 {dimension_numbers = #tpu.dot_dimension_numbers<[1], [0], [0], [1], [0, 0, 1, 1], [], []>} : vector<32x8xbf16>, vector<8x384xbf16>, vector<32x384xf32> -> vector<32x384xf32>
    %10 = arith.addf %4, %9 : vector<32x384xf32>
    %c2 = arith.constant 2 : index
    %c0_13 = arith.constant 0 : index
    %c0_14 = arith.constant 0 : index
    %11 = vector.load %arg2[%c2, %c0_13, %c0_14] : memref<9x32x8xbf16, #tpu.memory_space<vmem>>, vector<1x32x8xbf16>
    %12 = vector.shape_cast %11 : vector<1x32x8xbf16> to vector<32x8xbf16>
    %c0_15 = arith.constant 0 : index
    %c0_16 = arith.constant 0 : index
    %c0_17 = arith.constant 0 : index
    %c2_18 = arith.constant 2 : index
    %13 = vector.load %arg1[%c0_15, %c0_16, %c0_17, %c2_18] : memref<1x1x8x422xbf16, #tpu.memory_space<vmem>>, vector<1x1x8x384xbf16>
    %14 = vector.shape_cast %13 : vector<1x1x8x384xbf16> to vector<8x384xbf16>
    %cst_19 = arith.constant dense<0.000000e+00> : vector<32x384xf32>
    %15 = tpu.matmul %12, %14, %cst_19 {dimension_numbers = #tpu.dot_dimension_numbers<[1], [0], [0], [1], [0, 0, 1, 1], [], []>} : vector<32x8xbf16>, vector<8x384xbf16>, vector<32x384xf32> -> vector<32x384xf32>
    %16 = arith.addf %10, %15 : vector<32x384xf32>
    %c3 = arith.constant 3 : index
    %c0_20 = arith.constant 0 : index
    %c0_21 = arith.constant 0 : index
    %17 = vector.load %arg2[%c3, %c0_20, %c0_21] : memref<9x32x8xbf16, #tpu.memory_space<vmem>>, vector<1x32x8xbf16>
    %18 = vector.shape_cast %17 : vector<1x32x8xbf16> to vector<32x8xbf16>
    %c0_22 = arith.constant 0 : index
    %c0_23 = arith.constant 0 : index
    %c0_24 = arith.constant 0 : index
    %c18 = arith.constant 18 : index
    %19 = vector.load %arg1[%c0_22, %c0_23, %c0_24, %c18] : memref<1x1x8x422xbf16, #tpu.memory_space<vmem>>, vector<1x1x8x384xbf16>
    %20 = vector.shape_cast %19 : vector<1x1x8x384xbf16> to vector<8x384xbf16>
    %cst_25 = arith.constant dense<0.000000e+00> : vector<32x384xf32>
    %21 = tpu.matmul %18, %20, %cst_25 {dimension_numbers = #tpu.dot_dimension_numbers<[1], [0], [0], [1], [0, 0, 1, 1], [], []>} : vector<32x8xbf16>, vector<8x384xbf16>, vector<32x384xf32> -> vector<32x384xf32>
    %22 = arith.addf %16, %21 : vector<32x384xf32>
    %c4 = arith.constant 4 : index
    %c0_26 = arith.constant 0 : index
    %c0_27 = arith.constant 0 : index
    %23 = vector.load %arg2[%c4, %c0_26, %c0_27] : memref<9x32x8xbf16, #tpu.memory_space<vmem>>, vector<1x32x8xbf16>
    %24 = vector.shape_cast %23 : vector<1x32x8xbf16> to vector<32x8xbf16>
    %c0_28 = arith.constant 0 : index
    %c0_29 = arith.constant 0 : index
    %c0_30 = arith.constant 0 : index
    %c19 = arith.constant 19 : index
    %25 = vector.load %arg1[%c0_28, %c0_29, %c0_30, %c19] : memref<1x1x8x422xbf16, #tpu.memory_space<vmem>>, vector<1x1x8x384xbf16>
    %26 = vector.shape_cast %25 : vector<1x1x8x384xbf16> to vector<8x384xbf16>
    %cst_31 = arith.constant dense<0.000000e+00> : vector<32x384xf32>
    %27 = tpu.matmul %24, %26, %cst_31 {dimension_numbers = #tpu.dot_dimension_numbers<[1], [0], [0], [1], [0, 0, 1, 1], [], []>} : vector<32x8xbf16>, vector<8x384xbf16>, vector<32x384xf32> -> vector<32x384xf32>
    %28 = arith.addf %22, %27 : vector<32x384xf32>
    %c5 = arith.constant 5 : index
    %c0_32 = arith.constant 0 : index
    %c0_33 = arith.constant 0 : index
    %29 = vector.load %arg2[%c5, %c0_32, %c0_33] : memref<9x32x8xbf16, #tpu.memory_space<vmem>>, vector<1x32x8xbf16>
    %30 = vector.shape_cast %29 : vector<1x32x8xbf16> to vector<32x8xbf16>
    %c0_34 = arith.constant 0 : index
    %c0_35 = arith.constant 0 : index
    %c0_36 = arith.constant 0 : index
    %c20 = arith.constant 20 : index
    %31 = vector.load %arg1[%c0_34, %c0_35, %c0_36, %c20] : memref<1x1x8x422xbf16, #tpu.memory_space<vmem>>, vector<1x1x8x384xbf16>
    %32 = vector.shape_cast %31 : vector<1x1x8x384xbf16> to vector<8x384xbf16>
    %cst_37 = arith.constant dense<0.000000e+00> : vector<32x384xf32>
    %33 = tpu.matmul %30, %32, %cst_37 {dimension_numbers = #tpu.dot_dimension_numbers<[1], [0], [0], [1], [0, 0, 1, 1], [], []>} : vector<32x8xbf16>, vector<8x384xbf16>, vector<32x384xf32> -> vector<32x384xf32>
    %34 = arith.addf %28, %33 : vector<32x384xf32>
    %c6 = arith.constant 6 : index
    %c0_38 = arith.constant 0 : index
    %c0_39 = arith.constant 0 : index
    %35 = vector.load %arg2[%c6, %c0_38, %c0_39] : memref<9x32x8xbf16, #tpu.memory_space<vmem>>, vector<1x32x8xbf16>
    %36 = vector.shape_cast %35 : vector<1x32x8xbf16> to vector<32x8xbf16>
    %c0_40 = arith.constant 0 : index
    %c0_41 = arith.constant 0 : index
    %c0_42 = arith.constant 0 : index
    %c36 = arith.constant 36 : index
    %37 = vector.load %arg1[%c0_40, %c0_41, %c0_42, %c36] : memref<1x1x8x422xbf16, #tpu.memory_space<vmem>>, vector<1x1x8x384xbf16>
    %38 = vector.shape_cast %37 : vector<1x1x8x384xbf16> to vector<8x384xbf16>
    %cst_43 = arith.constant dense<0.000000e+00> : vector<32x384xf32>
    %39 = tpu.matmul %36, %38, %cst_43 {dimension_numbers = #tpu.dot_dimension_numbers<[1], [0], [0], [1], [0, 0, 1, 1], [], []>} : vector<32x8xbf16>, vector<8x384xbf16>, vector<32x384xf32> -> vector<32x384xf32>
    %40 = arith.addf %34, %39 : vector<32x384xf32>
    %c7 = arith.constant 7 : index
    %c0_44 = arith.constant 0 : index
    %c0_45 = arith.constant 0 : index
    %41 = vector.load %arg2[%c7, %c0_44, %c0_45] : memref<9x32x8xbf16, #tpu.memory_space<vmem>>, vector<1x32x8xbf16>
    %42 = vector.shape_cast %41 : vector<1x32x8xbf16> to vector<32x8xbf16>
    %c0_46 = arith.constant 0 : index
    %c0_47 = arith.constant 0 : index
    %c0_48 = arith.constant 0 : index
    %c37 = arith.constant 37 : index
    %43 = vector.load %arg1[%c0_46, %c0_47, %c0_48, %c37] : memref<1x1x8x422xbf16, #tpu.memory_space<vmem>>, vector<1x1x8x384xbf16>
    %44 = vector.shape_cast %43 : vector<1x1x8x384xbf16> to vector<8x384xbf16>
    %cst_49 = arith.constant dense<0.000000e+00> : vector<32x384xf32>
    %45 = tpu.matmul %42, %44, %cst_49 {dimension_numbers = #tpu.dot_dimension_numbers<[1], [0], [0], [1], [0, 0, 1, 1], [], []>} : vector<32x8xbf16>, vector<8x384xbf16>, vector<32x384xf32> -> vector<32x384xf32>
    %46 = arith.addf %40, %45 : vector<32x384xf32>
    %c8 = arith.constant 8 : index
    %c0_50 = arith.constant 0 : index
    %c0_51 = arith.constant 0 : index
    %47 = vector.load %arg2[%c8, %c0_50, %c0_51] : memref<9x32x8xbf16, #tpu.memory_space<vmem>>, vector<1x32x8xbf16>
    %48 = vector.shape_cast %47 : vector<1x32x8xbf16> to vector<32x8xbf16>
    %c0_52 = arith.constant 0 : index
    %c0_53 = arith.constant 0 : index
    %c0_54 = arith.constant 0 : index
    %c38 = arith.constant 38 : index
    %49 = vector.load %arg1[%c0_52, %c0_53, %c0_54, %c38] : memref<1x1x8x422xbf16, #tpu.memory_space<vmem>>, vector<1x1x8x384xbf16>
    %50 = vector.shape_cast %49 : vector<1x1x8x384xbf16> to vector<8x384xbf16>
    %cst_55 = arith.constant dense<0.000000e+00> : vector<32x384xf32>
    %51 = tpu.matmul %48, %50, %cst_55 {dimension_numbers = #tpu.dot_dimension_numbers<[1], [0], [0], [1], [0, 0, 1, 1], [], []>} : vector<32x8xbf16>, vector<8x384xbf16>, vector<32x384xf32> -> vector<32x384xf32>
    %52 = arith.addf %46, %51 : vector<32x384xf32>
    %c0_56 = arith.constant 0 : index
    %c0_57 = arith.constant 0 : index
    %53 = vector.load %arg3[%c0_56, %c0_57] : memref<32x3xf32, #tpu.memory_space<vmem>>, vector<32x3xf32>
    %54 = vector.extract_strided_slice %53 {offsets = [0, 0], sizes = [32, 1], strides = [1, 1]} : vector<32x3xf32> to vector<32x1xf32>
    %55 = vector.broadcast %54 : vector<32x1xf32> to vector<32x384xf32>
    %56 = arith.addf %52, %55 : vector<32x384xf32>
    %57 = tpu.iota {dimensions = array<i32: 1>} : vector<1x384xi32>
    %c288_i32 = arith.constant 288 : i32
    %58 = vector.broadcast %c288_i32 : i32 to vector<1x384xi32>
    %59 = arith.cmpi slt, %57, %58 : vector<1x384xi32>
    %c18_i32 = arith.constant 18 : i32
    %c0_i32 = arith.constant 0 : i32
    %60 = arith.cmpi eq, %c18_i32, %c0_i32 : i32
    %c1_i32 = arith.constant 1 : i32
    %61 = arith.select %60, %c1_i32, %c18_i32 : i32
    %62 = vector.broadcast %61 : i32 to vector<1x384xi32>
    %63 = arith.remsi %57, %62 : vector<1x384xi32>
    %c0_i32_58 = arith.constant 0 : i32
    %64 = vector.broadcast %c0_i32_58 : i32 to vector<1x384xi32>
    %65 = arith.cmpi ne, %63, %64 : vector<1x384xi32>
    %c0_i32_59 = arith.constant 0 : i32
    %66 = vector.broadcast %c0_i32_59 : i32 to vector<1x384xi32>
    %67 = arith.cmpi slt, %63, %66 : vector<1x384xi32>
    %c0_i32_60 = arith.constant 0 : i32
    %68 = arith.cmpi slt, %61, %c0_i32_60 : i32
    %69 = vector.broadcast %68 : i1 to vector<1x384xi1>
    %70 = vector.broadcast %69 : vector<1x384xi1> to vector<1x384xi1>
    %71 = arith.xori %67, %70 : vector<1x384xi1>
    %72 = arith.andi %71, %65 : vector<1x384xi1>
    %73 = vector.broadcast %61 : i32 to vector<1x384xi32>
    %74 = arith.addi %63, %73 : vector<1x384xi32>
    %75 = arith.select %72, %74, %63 : vector<1x384xi1>, vector<1x384xi32>
    %c16_i32 = arith.constant 16 : i32
    %76 = vector.broadcast %c16_i32 : i32 to vector<1x384xi32>
    %77 = arith.cmpi slt, %75, %76 : vector<1x384xi32>
    %78 = arith.andi %59, %77 : vector<1x384xi1>
    %79 = vector.extract_strided_slice %56 {offsets = [0, 0], sizes = [16, 384], strides = [1, 1]} : vector<32x384xf32> to vector<16x384xf32>
    %cst_61 = arith.constant 0.000000e+00 : f32
    %80 = vector.shape_cast %78 : vector<1x384xi1> to vector<1x384xi1>
    %81 = vector.broadcast %80 : vector<1x384xi1> to vector<16x384xi1>
    %82 = vector.broadcast %cst_61 : f32 to vector<16x384xf32>
    %83 = arith.select %81, %79, %82 : vector<16x384xi1>, vector<16x384xf32>
    %84 = vector.shape_cast %83 : vector<16x384xf32> to vector<1x16x384xf32>
    %cst_62 = arith.constant dense<0.000000e+00> : vector<1xf32>
    %85 = vector.multi_reduction <add>, %84, %cst_62 [1, 2] : vector<1x16x384xf32> to vector<1xf32>
    %86 = vector.shape_cast %85 : vector<1xf32> to vector<1x1x1xf32>
    %87 = vector.extract %86[0, 0, 0] : f32 from vector<1x1x1xf32>
    %88 = vector.broadcast %87 : f32 to vector<1x1xf32>
    %89 = arith.mulf %83, %83 : vector<16x384xf32>
    %90 = vector.shape_cast %89 : vector<16x384xf32> to vector<1x16x384xf32>
    %cst_63 = arith.constant dense<0.000000e+00> : vector<1xf32>
    %91 = vector.multi_reduction <add>, %90, %cst_63 [1, 2] : vector<1x16x384xf32> to vector<1xf32>
    %92 = vector.shape_cast %91 : vector<1xf32> to vector<1x1x1xf32>
    %93 = vector.extract %92[0, 0, 0] : f32 from vector<1x1x1xf32>
    %94 = vector.broadcast %93 : f32 to vector<1x1xf32>
    %cst_64 = arith.constant 4.096000e+03 : f32
    %95 = vector.broadcast %cst_64 : f32 to vector<1x1xf32>
    %96 = arith.divf %88, %95 : vector<1x1xf32>
    %cst_65 = arith.constant 4.096000e+03 : f32
    %97 = vector.broadcast %cst_65 : f32 to vector<1x1xf32>
    %98 = arith.divf %94, %97 : vector<1x1xf32>
    %99 = arith.mulf %96, %96 : vector<1x1xf32>
    %100 = arith.subf %98, %99 : vector<1x1xf32>
    %cst_66 = arith.constant 0.000000e+00 : f32
    %101 = vector.broadcast %cst_66 : f32 to vector<1x1xf32>
    %102 = arith.maximumf %100, %101 : vector<1x1xf32>
    %103 = vector.broadcast %96 : vector<1x1xf32> to vector<16x384xf32>
    %104 = arith.subf %79, %103 : vector<16x384xf32>
    %cst_67 = arith.constant 9.99999974E-6 : f32
    %105 = vector.broadcast %cst_67 : f32 to vector<1x1xf32>
    %106 = arith.addf %102, %105 : vector<1x1xf32>
    %107 = math.rsqrt %106 : vector<1x1xf32>
    %108 = vector.broadcast %107 : vector<1x1xf32> to vector<16x384xf32>
    %109 = arith.mulf %104, %108 : vector<16x384xf32>
    %110 = vector.extract_strided_slice %53 {offsets = [0, 1], sizes = [16, 1], strides = [1, 1]} : vector<32x3xf32> to vector<16x1xf32>
    %111 = vector.broadcast %110 : vector<16x1xf32> to vector<16x384xf32>
    %112 = arith.mulf %109, %111 : vector<16x384xf32>
    %113 = vector.extract_strided_slice %53 {offsets = [0, 2], sizes = [16, 1], strides = [1, 1]} : vector<32x3xf32> to vector<16x1xf32>
    %114 = vector.broadcast %113 : vector<16x1xf32> to vector<16x384xf32>
    %115 = arith.addf %112, %114 : vector<16x384xf32>
    %116 = arith.negf %115 : vector<16x384xf32>
    %117 = math.exp %116 : vector<16x384xf32>
    %cst_68 = arith.constant 1.000000e+00 : f32
    %118 = vector.broadcast %cst_68 : f32 to vector<16x384xf32>
    %119 = arith.addf %118, %117 : vector<16x384xf32>
    %120 = arith.divf %118, %119 : vector<16x384xf32>
    %121 = arith.mulf %115, %120 : vector<16x384xf32>
    %122 = arith.truncf %121 : vector<16x384xf32> to vector<16x384xbf16>
    %c0_69 = arith.constant 0 : index
    %c0_70 = arith.constant 0 : index
    %c0_71 = arith.constant 0 : index
    %123 = vector.load %arg4[%c0_69, %c0_70, %c0_71] : memref<1x32x384xbf16, #tpu.memory_space<vmem>>, vector<1x16x384xbf16>
    %124 = vector.shape_cast %123 : vector<1x16x384xbf16> to vector<16x384xbf16>
    %125 = vector.shape_cast %122 : vector<16x384xbf16> to vector<1x16x384xbf16>
    tpu.vector_store %arg4[%c0_69, %c0_70, %c0_71], %125 {strides = array<i32>} : memref<1x32x384xbf16, #tpu.memory_space<vmem>>, vector<1x16x384xbf16>,
    %126 = vector.extract_strided_slice %56 {offsets = [16, 0], sizes = [16, 384], strides = [1, 1]} : vector<32x384xf32> to vector<16x384xf32>
    %cst_72 = arith.constant 0.000000e+00 : f32
    %127 = vector.shape_cast %78 : vector<1x384xi1> to vector<1x384xi1>
    %128 = vector.broadcast %127 : vector<1x384xi1> to vector<16x384xi1>
    %129 = vector.broadcast %cst_72 : f32 to vector<16x384xf32>
    %130 = arith.select %128, %126, %129 : vector<16x384xi1>, vector<16x384xf32>
    %131 = vector.shape_cast %130 : vector<16x384xf32> to vector<1x16x384xf32>
    %cst_73 = arith.constant dense<0.000000e+00> : vector<1xf32>
    %132 = vector.multi_reduction <add>, %131, %cst_73 [1, 2] : vector<1x16x384xf32> to vector<1xf32>
    %133 = vector.shape_cast %132 : vector<1xf32> to vector<1x1x1xf32>
    %134 = vector.extract %133[0, 0, 0] : f32 from vector<1x1x1xf32>
    %135 = vector.broadcast %134 : f32 to vector<1x1xf32>
    %136 = arith.mulf %130, %130 : vector<16x384xf32>
    %137 = vector.shape_cast %136 : vector<16x384xf32> to vector<1x16x384xf32>
    %cst_74 = arith.constant dense<0.000000e+00> : vector<1xf32>
    %138 = vector.multi_reduction <add>, %137, %cst_74 [1, 2] : vector<1x16x384xf32> to vector<1xf32>
    %139 = vector.shape_cast %138 : vector<1xf32> to vector<1x1x1xf32>
    %140 = vector.extract %139[0, 0, 0] : f32 from vector<1x1x1xf32>
    %141 = vector.broadcast %140 : f32 to vector<1x1xf32>
    %cst_75 = arith.constant 4.096000e+03 : f32
    %142 = vector.broadcast %cst_75 : f32 to vector<1x1xf32>
    %143 = arith.divf %135, %142 : vector<1x1xf32>
    %cst_76 = arith.constant 4.096000e+03 : f32
    %144 = vector.broadcast %cst_76 : f32 to vector<1x1xf32>
    %145 = arith.divf %141, %144 : vector<1x1xf32>
    %146 = arith.mulf %143, %143 : vector<1x1xf32>
    %147 = arith.subf %145, %146 : vector<1x1xf32>
    %cst_77 = arith.constant 0.000000e+00 : f32
    %148 = vector.broadcast %cst_77 : f32 to vector<1x1xf32>
    %149 = arith.maximumf %147, %148 : vector<1x1xf32>
    %150 = vector.broadcast %143 : vector<1x1xf32> to vector<16x384xf32>
    %151 = arith.subf %126, %150 : vector<16x384xf32>
    %cst_78 = arith.constant 9.99999974E-6 : f32
    %152 = vector.broadcast %cst_78 : f32 to vector<1x1xf32>
    %153 = arith.addf %149, %152 : vector<1x1xf32>
    %154 = math.rsqrt %153 : vector<1x1xf32>
    %155 = vector.broadcast %154 : vector<1x1xf32> to vector<16x384xf32>
    %156 = arith.mulf %151, %155 : vector<16x384xf32>
    %157 = vector.extract_strided_slice %53 {offsets = [16, 1], sizes = [16, 1], strides = [1, 1]} : vector<32x3xf32> to vector<16x1xf32>
    %158 = vector.broadcast %157 : vector<16x1xf32> to vector<16x384xf32>
    %159 = arith.mulf %156, %158 : vector<16x384xf32>
    %160 = vector.extract_strided_slice %53 {offsets = [16, 2], sizes = [16, 1], strides = [1, 1]} : vector<32x3xf32> to vector<16x1xf32>
    %161 = vector.broadcast %160 : vector<16x1xf32> to vector<16x384xf32>
    %162 = arith.addf %159, %161 : vector<16x384xf32>
    %163 = arith.negf %162 : vector<16x384xf32>
    %164 = math.exp %163 : vector<16x384xf32>
    %cst_79 = arith.constant 1.000000e+00 : f32
    %165 = vector.broadcast %cst_79 : f32 to vector<16x384xf32>
    %166 = arith.addf %165, %164 : vector<16x384xf32>
    %167 = arith.divf %165, %166 : vector<16x384xf32>
    %168 = arith.mulf %162, %167 : vector<16x384xf32>
    %169 = arith.truncf %168 : vector<16x384xf32> to vector<16x384xbf16>
    %c0_80 = arith.constant 0 : index
    %c16 = arith.constant 16 : index
    %c0_81 = arith.constant 0 : index
    %170 = vector.load %arg4[%c0_80, %c16, %c0_81] : memref<1x32x384xbf16, #tpu.memory_space<vmem>>, vector<1x16x384xbf16>
    %171 = vector.shape_cast %170 : vector<1x16x384xbf16> to vector<16x384xbf16>
    %172 = vector.shape_cast %169 : vector<16x384xbf16> to vector<1x16x384xbf16>
    tpu.vector_store %arg4[%c0_80, %c16, %c0_81], %172 {strides = array<i32>} : memref<1x32x384xbf16, #tpu.memory_space<vmem>>, vector<1x16x384xbf16>,
    return
  }
  func.func @transform_0(%arg0: i32) -> (i32, i32, i32, i32) {
    %c0_i32 = arith.constant 0 : i32
    %c0_i32_0 = arith.constant 0 : i32
    %c0_i32_1 = arith.constant 0 : i32
    %c0_i32_2 = arith.constant 0 : i32
    return %arg0, %c0_i32, %c0_i32_0, %c0_i32_1 : i32, i32, i32, i32
  }
  func.func @transform_1(%arg0: i32) -> (i32, i32, i32) {
    %c0_i32 = arith.constant 0 : i32
    %c0_i32_0 = arith.constant 0 : i32
    %c0_i32_1 = arith.constant 0 : i32
    %c0_i32_2 = arith.constant 0 : i32
    return %c0_i32, %c0_i32_0, %c0_i32_1 : i32, i32, i32
  }
  func.func @transform_2(%arg0: i32) -> (i32, i32) {
    %c0_i32 = arith.constant 0 : i32
    %c0_i32_0 = arith.constant 0 : i32
    %c0_i32_1 = arith.constant 0 : i32
    return %c0_i32, %c0_i32_0 : i32, i32
  }
  func.func @transform_3(%arg0: i32) -> (i32, i32, i32) {
    %c0_i32 = arith.constant 0 : i32
    %c0_i32_0 = arith.constant 0 : i32
    %c0_i32_1 = arith.constant 0 : i32
    return %arg0, %c0_i32, %c0_i32_0 : i32, i32, i32
  }
}

module attributes {stable_mosaic.version = 11 : i64} {
  func.func @_convsc_kernel(%arg0: i32, %arg1: memref<1x4x32x138xbf16, #tpu.memory_space<vmem>>, %arg2: memref<9x32x32xbf16, #tpu.memory_space<vmem>>, %arg3: memref<32x3xf32, #tpu.memory_space<vmem>>, %arg4: memref<1x32x128xbf16, #tpu.memory_space<vmem>>) attributes {dimension_semantics = [#tpu.dimension_semantics<parallel>], iteration_bounds = array<i64: 2>, scalar_prefetch = 0 : i64, scratch_operands = 0 : i64, tpu.core_type = #tpu.core_type<tc>, window_params = [{transform_indices = @transform_0, window_bounds = array<i64: 1, 4, 32, 138>}, {pipeline_mode = #tpu.pipeline_mode<synchronous>, transform_indices = @transform_1, window_bounds = array<i64: 9, 32, 32>}, {pipeline_mode = #tpu.pipeline_mode<synchronous>, transform_indices = @transform_2, window_bounds = array<i64: 32, 3>}, {transform_indices = @transform_3, window_bounds = array<i64: 1, 32, 128>}]} {
    %c0 = arith.constant 0 : index
    %c0_0 = arith.constant 0 : index
    %c0_1 = arith.constant 0 : index
    %0 = vector.load %arg2[%c0, %c0_0, %c0_1] : memref<9x32x32xbf16, #tpu.memory_space<vmem>>, vector<1x32x32xbf16>
    %1 = vector.shape_cast %0 : vector<1x32x32xbf16> to vector<32x32xbf16>
    %c0_2 = arith.constant 0 : index
    %c0_3 = arith.constant 0 : index
    %c0_4 = arith.constant 0 : index
    %c0_5 = arith.constant 0 : index
    %2 = vector.load %arg1[%c0_2, %c0_3, %c0_4, %c0_5] : memref<1x4x32x138xbf16, #tpu.memory_space<vmem>>, vector<1x1x32x128xbf16>
    %3 = vector.shape_cast %2 : vector<1x1x32x128xbf16> to vector<32x128xbf16>
    %cst = arith.constant dense<0.000000e+00> : vector<32x128xf32>
    %4 = tpu.matmul %1, %3, %cst {dimension_numbers = #tpu.dot_dimension_numbers<[1], [0], [0], [1], [0, 0, 1, 1], [], []>} : vector<32x32xbf16>, vector<32x128xbf16>, vector<32x128xf32> -> vector<32x128xf32>
    %c1 = arith.constant 1 : index
    %c0_6 = arith.constant 0 : index
    %c0_7 = arith.constant 0 : index
    %5 = vector.load %arg2[%c1, %c0_6, %c0_7] : memref<9x32x32xbf16, #tpu.memory_space<vmem>>, vector<1x32x32xbf16>
    %6 = vector.shape_cast %5 : vector<1x32x32xbf16> to vector<32x32xbf16>
    %c0_8 = arith.constant 0 : index
    %c1_9 = arith.constant 1 : index
    %c0_10 = arith.constant 0 : index
    %c0_11 = arith.constant 0 : index
    %7 = vector.load %arg1[%c0_8, %c1_9, %c0_10, %c0_11] : memref<1x4x32x138xbf16, #tpu.memory_space<vmem>>, vector<1x1x32x128xbf16>
    %8 = vector.shape_cast %7 : vector<1x1x32x128xbf16> to vector<32x128xbf16>
    %cst_12 = arith.constant dense<0.000000e+00> : vector<32x128xf32>
    %9 = tpu.matmul %6, %8, %cst_12 {dimension_numbers = #tpu.dot_dimension_numbers<[1], [0], [0], [1], [0, 0, 1, 1], [], []>} : vector<32x32xbf16>, vector<32x128xbf16>, vector<32x128xf32> -> vector<32x128xf32>
    %10 = arith.addf %4, %9 : vector<32x128xf32>
    %c2 = arith.constant 2 : index
    %c0_13 = arith.constant 0 : index
    %c0_14 = arith.constant 0 : index
    %11 = vector.load %arg2[%c2, %c0_13, %c0_14] : memref<9x32x32xbf16, #tpu.memory_space<vmem>>, vector<1x32x32xbf16>
    %12 = vector.shape_cast %11 : vector<1x32x32xbf16> to vector<32x32xbf16>
    %c0_15 = arith.constant 0 : index
    %c0_16 = arith.constant 0 : index
    %c0_17 = arith.constant 0 : index
    %c1_18 = arith.constant 1 : index
    %13 = vector.load %arg1[%c0_15, %c0_16, %c0_17, %c1_18] : memref<1x4x32x138xbf16, #tpu.memory_space<vmem>>, vector<1x1x32x128xbf16>
    %14 = vector.shape_cast %13 : vector<1x1x32x128xbf16> to vector<32x128xbf16>
    %cst_19 = arith.constant dense<0.000000e+00> : vector<32x128xf32>
    %15 = tpu.matmul %12, %14, %cst_19 {dimension_numbers = #tpu.dot_dimension_numbers<[1], [0], [0], [1], [0, 0, 1, 1], [], []>} : vector<32x32xbf16>, vector<32x128xbf16>, vector<32x128xf32> -> vector<32x128xf32>
    %16 = arith.addf %10, %15 : vector<32x128xf32>
    %c3 = arith.constant 3 : index
    %c0_20 = arith.constant 0 : index
    %c0_21 = arith.constant 0 : index
    %17 = vector.load %arg2[%c3, %c0_20, %c0_21] : memref<9x32x32xbf16, #tpu.memory_space<vmem>>, vector<1x32x32xbf16>
    %18 = vector.shape_cast %17 : vector<1x32x32xbf16> to vector<32x32xbf16>
    %c0_22 = arith.constant 0 : index
    %c2_23 = arith.constant 2 : index
    %c0_24 = arith.constant 0 : index
    %c0_25 = arith.constant 0 : index
    %19 = vector.load %arg1[%c0_22, %c2_23, %c0_24, %c0_25] : memref<1x4x32x138xbf16, #tpu.memory_space<vmem>>, vector<1x1x32x128xbf16>
    %20 = vector.shape_cast %19 : vector<1x1x32x128xbf16> to vector<32x128xbf16>
    %cst_26 = arith.constant dense<0.000000e+00> : vector<32x128xf32>
    %21 = tpu.matmul %18, %20, %cst_26 {dimension_numbers = #tpu.dot_dimension_numbers<[1], [0], [0], [1], [0, 0, 1, 1], [], []>} : vector<32x32xbf16>, vector<32x128xbf16>, vector<32x128xf32> -> vector<32x128xf32>
    %22 = arith.addf %16, %21 : vector<32x128xf32>
    %c4 = arith.constant 4 : index
    %c0_27 = arith.constant 0 : index
    %c0_28 = arith.constant 0 : index
    %23 = vector.load %arg2[%c4, %c0_27, %c0_28] : memref<9x32x32xbf16, #tpu.memory_space<vmem>>, vector<1x32x32xbf16>
    %24 = vector.shape_cast %23 : vector<1x32x32xbf16> to vector<32x32xbf16>
    %c0_29 = arith.constant 0 : index
    %c3_30 = arith.constant 3 : index
    %c0_31 = arith.constant 0 : index
    %c0_32 = arith.constant 0 : index
    %25 = vector.load %arg1[%c0_29, %c3_30, %c0_31, %c0_32] : memref<1x4x32x138xbf16, #tpu.memory_space<vmem>>, vector<1x1x32x128xbf16>
    %26 = vector.shape_cast %25 : vector<1x1x32x128xbf16> to vector<32x128xbf16>
    %cst_33 = arith.constant dense<0.000000e+00> : vector<32x128xf32>
    %27 = tpu.matmul %24, %26, %cst_33 {dimension_numbers = #tpu.dot_dimension_numbers<[1], [0], [0], [1], [0, 0, 1, 1], [], []>} : vector<32x32xbf16>, vector<32x128xbf16>, vector<32x128xf32> -> vector<32x128xf32>
    %28 = arith.addf %22, %27 : vector<32x128xf32>
    %c5 = arith.constant 5 : index
    %c0_34 = arith.constant 0 : index
    %c0_35 = arith.constant 0 : index
    %29 = vector.load %arg2[%c5, %c0_34, %c0_35] : memref<9x32x32xbf16, #tpu.memory_space<vmem>>, vector<1x32x32xbf16>
    %30 = vector.shape_cast %29 : vector<1x32x32xbf16> to vector<32x32xbf16>
    %c0_36 = arith.constant 0 : index
    %c2_37 = arith.constant 2 : index
    %c0_38 = arith.constant 0 : index
    %c1_39 = arith.constant 1 : index
    %31 = vector.load %arg1[%c0_36, %c2_37, %c0_38, %c1_39] : memref<1x4x32x138xbf16, #tpu.memory_space<vmem>>, vector<1x1x32x128xbf16>
    %32 = vector.shape_cast %31 : vector<1x1x32x128xbf16> to vector<32x128xbf16>
    %cst_40 = arith.constant dense<0.000000e+00> : vector<32x128xf32>
    %33 = tpu.matmul %30, %32, %cst_40 {dimension_numbers = #tpu.dot_dimension_numbers<[1], [0], [0], [1], [0, 0, 1, 1], [], []>} : vector<32x32xbf16>, vector<32x128xbf16>, vector<32x128xf32> -> vector<32x128xf32>
    %34 = arith.addf %28, %33 : vector<32x128xf32>
    %c6 = arith.constant 6 : index
    %c0_41 = arith.constant 0 : index
    %c0_42 = arith.constant 0 : index
    %35 = vector.load %arg2[%c6, %c0_41, %c0_42] : memref<9x32x32xbf16, #tpu.memory_space<vmem>>, vector<1x32x32xbf16>
    %36 = vector.shape_cast %35 : vector<1x32x32xbf16> to vector<32x32xbf16>
    %c0_43 = arith.constant 0 : index
    %c0_44 = arith.constant 0 : index
    %c0_45 = arith.constant 0 : index
    %c9 = arith.constant 9 : index
    %37 = vector.load %arg1[%c0_43, %c0_44, %c0_45, %c9] : memref<1x4x32x138xbf16, #tpu.memory_space<vmem>>, vector<1x1x32x128xbf16>
    %38 = vector.shape_cast %37 : vector<1x1x32x128xbf16> to vector<32x128xbf16>
    %cst_46 = arith.constant dense<0.000000e+00> : vector<32x128xf32>
    %39 = tpu.matmul %36, %38, %cst_46 {dimension_numbers = #tpu.dot_dimension_numbers<[1], [0], [0], [1], [0, 0, 1, 1], [], []>} : vector<32x32xbf16>, vector<32x128xbf16>, vector<32x128xf32> -> vector<32x128xf32>
    %40 = arith.addf %34, %39 : vector<32x128xf32>
    %c7 = arith.constant 7 : index
    %c0_47 = arith.constant 0 : index
    %c0_48 = arith.constant 0 : index
    %41 = vector.load %arg2[%c7, %c0_47, %c0_48] : memref<9x32x32xbf16, #tpu.memory_space<vmem>>, vector<1x32x32xbf16>
    %42 = vector.shape_cast %41 : vector<1x32x32xbf16> to vector<32x32xbf16>
    %c0_49 = arith.constant 0 : index
    %c1_50 = arith.constant 1 : index
    %c0_51 = arith.constant 0 : index
    %c9_52 = arith.constant 9 : index
    %43 = vector.load %arg1[%c0_49, %c1_50, %c0_51, %c9_52] : memref<1x4x32x138xbf16, #tpu.memory_space<vmem>>, vector<1x1x32x128xbf16>
    %44 = vector.shape_cast %43 : vector<1x1x32x128xbf16> to vector<32x128xbf16>
    %cst_53 = arith.constant dense<0.000000e+00> : vector<32x128xf32>
    %45 = tpu.matmul %42, %44, %cst_53 {dimension_numbers = #tpu.dot_dimension_numbers<[1], [0], [0], [1], [0, 0, 1, 1], [], []>} : vector<32x32xbf16>, vector<32x128xbf16>, vector<32x128xf32> -> vector<32x128xf32>
    %46 = arith.addf %40, %45 : vector<32x128xf32>
    %c8 = arith.constant 8 : index
    %c0_54 = arith.constant 0 : index
    %c0_55 = arith.constant 0 : index
    %47 = vector.load %arg2[%c8, %c0_54, %c0_55] : memref<9x32x32xbf16, #tpu.memory_space<vmem>>, vector<1x32x32xbf16>
    %48 = vector.shape_cast %47 : vector<1x32x32xbf16> to vector<32x32xbf16>
    %c0_56 = arith.constant 0 : index
    %c0_57 = arith.constant 0 : index
    %c0_58 = arith.constant 0 : index
    %c10 = arith.constant 10 : index
    %49 = vector.load %arg1[%c0_56, %c0_57, %c0_58, %c10] : memref<1x4x32x138xbf16, #tpu.memory_space<vmem>>, vector<1x1x32x128xbf16>
    %50 = vector.shape_cast %49 : vector<1x1x32x128xbf16> to vector<32x128xbf16>
    %cst_59 = arith.constant dense<0.000000e+00> : vector<32x128xf32>
    %51 = tpu.matmul %48, %50, %cst_59 {dimension_numbers = #tpu.dot_dimension_numbers<[1], [0], [0], [1], [0, 0, 1, 1], [], []>} : vector<32x32xbf16>, vector<32x128xbf16>, vector<32x128xf32> -> vector<32x128xf32>
    %52 = arith.addf %46, %51 : vector<32x128xf32>
    %c0_60 = arith.constant 0 : index
    %c0_61 = arith.constant 0 : index
    %53 = vector.load %arg3[%c0_60, %c0_61] : memref<32x3xf32, #tpu.memory_space<vmem>>, vector<32x3xf32>
    %54 = vector.extract_strided_slice %53 {offsets = [0, 0], sizes = [32, 1], strides = [1, 1]} : vector<32x3xf32> to vector<32x1xf32>
    %55 = vector.broadcast %54 : vector<32x1xf32> to vector<32x128xf32>
    %56 = arith.addf %52, %55 : vector<32x128xf32>
    %57 = tpu.iota {dimensions = array<i32: 1>} : vector<1x128xi32>
    %c72_i32 = arith.constant 72 : i32
    %58 = vector.broadcast %c72_i32 : i32 to vector<1x128xi32>
    %59 = arith.cmpi slt, %57, %58 : vector<1x128xi32>
    %c9_i32 = arith.constant 9 : i32
    %c0_i32 = arith.constant 0 : i32
    %60 = arith.cmpi eq, %c9_i32, %c0_i32 : i32
    %c1_i32 = arith.constant 1 : i32
    %61 = arith.select %60, %c1_i32, %c9_i32 : i32
    %62 = vector.broadcast %61 : i32 to vector<1x128xi32>
    %63 = arith.remsi %57, %62 : vector<1x128xi32>
    %c0_i32_62 = arith.constant 0 : i32
    %64 = vector.broadcast %c0_i32_62 : i32 to vector<1x128xi32>
    %65 = arith.cmpi ne, %63, %64 : vector<1x128xi32>
    %c0_i32_63 = arith.constant 0 : i32
    %66 = vector.broadcast %c0_i32_63 : i32 to vector<1x128xi32>
    %67 = arith.cmpi slt, %63, %66 : vector<1x128xi32>
    %c0_i32_64 = arith.constant 0 : i32
    %68 = arith.cmpi slt, %61, %c0_i32_64 : i32
    %69 = vector.broadcast %68 : i1 to vector<1x128xi1>
    %70 = vector.broadcast %69 : vector<1x128xi1> to vector<1x128xi1>
    %71 = arith.xori %67, %70 : vector<1x128xi1>
    %72 = arith.andi %71, %65 : vector<1x128xi1>
    %73 = vector.broadcast %61 : i32 to vector<1x128xi32>
    %74 = arith.addi %63, %73 : vector<1x128xi32>
    %75 = arith.select %72, %74, %63 : vector<1x128xi1>, vector<1x128xi32>
    %c8_i32 = arith.constant 8 : i32
    %76 = vector.broadcast %c8_i32 : i32 to vector<1x128xi32>
    %77 = arith.cmpi slt, %75, %76 : vector<1x128xi32>
    %78 = arith.andi %59, %77 : vector<1x128xi1>
    %79 = vector.extract_strided_slice %56 {offsets = [0, 0], sizes = [16, 128], strides = [1, 1]} : vector<32x128xf32> to vector<16x128xf32>
    %cst_65 = arith.constant 0.000000e+00 : f32
    %80 = vector.shape_cast %78 : vector<1x128xi1> to vector<1x128xi1>
    %81 = vector.broadcast %80 : vector<1x128xi1> to vector<16x128xi1>
    %82 = vector.broadcast %cst_65 : f32 to vector<16x128xf32>
    %83 = arith.select %81, %79, %82 : vector<16x128xi1>, vector<16x128xf32>
    %84 = vector.shape_cast %83 : vector<16x128xf32> to vector<1x16x128xf32>
    %cst_66 = arith.constant dense<0.000000e+00> : vector<1xf32>
    %85 = vector.multi_reduction <add>, %84, %cst_66 [1, 2] : vector<1x16x128xf32> to vector<1xf32>
    %86 = vector.shape_cast %85 : vector<1xf32> to vector<1x1x1xf32>
    %87 = vector.extract %86[0, 0, 0] : f32 from vector<1x1x1xf32>
    %88 = vector.broadcast %87 : f32 to vector<1x1xf32>
    %89 = arith.mulf %83, %83 : vector<16x128xf32>
    %90 = vector.shape_cast %89 : vector<16x128xf32> to vector<1x16x128xf32>
    %cst_67 = arith.constant dense<0.000000e+00> : vector<1xf32>
    %91 = vector.multi_reduction <add>, %90, %cst_67 [1, 2] : vector<1x16x128xf32> to vector<1xf32>
    %92 = vector.shape_cast %91 : vector<1xf32> to vector<1x1x1xf32>
    %93 = vector.extract %92[0, 0, 0] : f32 from vector<1x1x1xf32>
    %94 = vector.broadcast %93 : f32 to vector<1x1xf32>
    %cst_68 = arith.constant 1.024000e+03 : f32
    %95 = vector.broadcast %cst_68 : f32 to vector<1x1xf32>
    %96 = arith.divf %88, %95 : vector<1x1xf32>
    %cst_69 = arith.constant 1.024000e+03 : f32
    %97 = vector.broadcast %cst_69 : f32 to vector<1x1xf32>
    %98 = arith.divf %94, %97 : vector<1x1xf32>
    %99 = arith.mulf %96, %96 : vector<1x1xf32>
    %100 = arith.subf %98, %99 : vector<1x1xf32>
    %cst_70 = arith.constant 0.000000e+00 : f32
    %101 = vector.broadcast %cst_70 : f32 to vector<1x1xf32>
    %102 = arith.maximumf %100, %101 : vector<1x1xf32>
    %103 = vector.broadcast %96 : vector<1x1xf32> to vector<16x128xf32>
    %104 = arith.subf %79, %103 : vector<16x128xf32>
    %cst_71 = arith.constant 9.99999974E-6 : f32
    %105 = vector.broadcast %cst_71 : f32 to vector<1x1xf32>
    %106 = arith.addf %102, %105 : vector<1x1xf32>
    %107 = math.rsqrt %106 : vector<1x1xf32>
    %108 = vector.broadcast %107 : vector<1x1xf32> to vector<16x128xf32>
    %109 = arith.mulf %104, %108 : vector<16x128xf32>
    %110 = vector.extract_strided_slice %53 {offsets = [0, 1], sizes = [16, 1], strides = [1, 1]} : vector<32x3xf32> to vector<16x1xf32>
    %111 = vector.broadcast %110 : vector<16x1xf32> to vector<16x128xf32>
    %112 = arith.mulf %109, %111 : vector<16x128xf32>
    %113 = vector.extract_strided_slice %53 {offsets = [0, 2], sizes = [16, 1], strides = [1, 1]} : vector<32x3xf32> to vector<16x1xf32>
    %114 = vector.broadcast %113 : vector<16x1xf32> to vector<16x128xf32>
    %115 = arith.addf %112, %114 : vector<16x128xf32>
    %116 = arith.negf %115 : vector<16x128xf32>
    %117 = math.exp %116 : vector<16x128xf32>
    %cst_72 = arith.constant 1.000000e+00 : f32
    %118 = vector.broadcast %cst_72 : f32 to vector<16x128xf32>
    %119 = arith.addf %118, %117 : vector<16x128xf32>
    %120 = arith.divf %118, %119 : vector<16x128xf32>
    %121 = arith.mulf %115, %120 : vector<16x128xf32>
    %122 = arith.truncf %121 : vector<16x128xf32> to vector<16x128xbf16>
    %c0_73 = arith.constant 0 : index
    %c0_74 = arith.constant 0 : index
    %c0_75 = arith.constant 0 : index
    %123 = vector.load %arg4[%c0_73, %c0_74, %c0_75] : memref<1x32x128xbf16, #tpu.memory_space<vmem>>, vector<1x16x128xbf16>
    %124 = vector.shape_cast %123 : vector<1x16x128xbf16> to vector<16x128xbf16>
    %125 = vector.shape_cast %122 : vector<16x128xbf16> to vector<1x16x128xbf16>
    tpu.vector_store %arg4[%c0_73, %c0_74, %c0_75], %125 {strides = array<i32>} : memref<1x32x128xbf16, #tpu.memory_space<vmem>>, vector<1x16x128xbf16>,
    %126 = vector.extract_strided_slice %56 {offsets = [16, 0], sizes = [16, 128], strides = [1, 1]} : vector<32x128xf32> to vector<16x128xf32>
    %cst_76 = arith.constant 0.000000e+00 : f32
    %127 = vector.shape_cast %78 : vector<1x128xi1> to vector<1x128xi1>
    %128 = vector.broadcast %127 : vector<1x128xi1> to vector<16x128xi1>
    %129 = vector.broadcast %cst_76 : f32 to vector<16x128xf32>
    %130 = arith.select %128, %126, %129 : vector<16x128xi1>, vector<16x128xf32>
    %131 = vector.shape_cast %130 : vector<16x128xf32> to vector<1x16x128xf32>
    %cst_77 = arith.constant dense<0.000000e+00> : vector<1xf32>
    %132 = vector.multi_reduction <add>, %131, %cst_77 [1, 2] : vector<1x16x128xf32> to vector<1xf32>
    %133 = vector.shape_cast %132 : vector<1xf32> to vector<1x1x1xf32>
    %134 = vector.extract %133[0, 0, 0] : f32 from vector<1x1x1xf32>
    %135 = vector.broadcast %134 : f32 to vector<1x1xf32>
    %136 = arith.mulf %130, %130 : vector<16x128xf32>
    %137 = vector.shape_cast %136 : vector<16x128xf32> to vector<1x16x128xf32>
    %cst_78 = arith.constant dense<0.000000e+00> : vector<1xf32>
    %138 = vector.multi_reduction <add>, %137, %cst_78 [1, 2] : vector<1x16x128xf32> to vector<1xf32>
    %139 = vector.shape_cast %138 : vector<1xf32> to vector<1x1x1xf32>
    %140 = vector.extract %139[0, 0, 0] : f32 from vector<1x1x1xf32>
    %141 = vector.broadcast %140 : f32 to vector<1x1xf32>
    %cst_79 = arith.constant 1.024000e+03 : f32
    %142 = vector.broadcast %cst_79 : f32 to vector<1x1xf32>
    %143 = arith.divf %135, %142 : vector<1x1xf32>
    %cst_80 = arith.constant 1.024000e+03 : f32
    %144 = vector.broadcast %cst_80 : f32 to vector<1x1xf32>
    %145 = arith.divf %141, %144 : vector<1x1xf32>
    %146 = arith.mulf %143, %143 : vector<1x1xf32>
    %147 = arith.subf %145, %146 : vector<1x1xf32>
    %cst_81 = arith.constant 0.000000e+00 : f32
    %148 = vector.broadcast %cst_81 : f32 to vector<1x1xf32>
    %149 = arith.maximumf %147, %148 : vector<1x1xf32>
    %150 = vector.broadcast %143 : vector<1x1xf32> to vector<16x128xf32>
    %151 = arith.subf %126, %150 : vector<16x128xf32>
    %cst_82 = arith.constant 9.99999974E-6 : f32
    %152 = vector.broadcast %cst_82 : f32 to vector<1x1xf32>
    %153 = arith.addf %149, %152 : vector<1x1xf32>
    %154 = math.rsqrt %153 : vector<1x1xf32>
    %155 = vector.broadcast %154 : vector<1x1xf32> to vector<16x128xf32>
    %156 = arith.mulf %151, %155 : vector<16x128xf32>
    %157 = vector.extract_strided_slice %53 {offsets = [16, 1], sizes = [16, 1], strides = [1, 1]} : vector<32x3xf32> to vector<16x1xf32>
    %158 = vector.broadcast %157 : vector<16x1xf32> to vector<16x128xf32>
    %159 = arith.mulf %156, %158 : vector<16x128xf32>
    %160 = vector.extract_strided_slice %53 {offsets = [16, 2], sizes = [16, 1], strides = [1, 1]} : vector<32x3xf32> to vector<16x1xf32>
    %161 = vector.broadcast %160 : vector<16x1xf32> to vector<16x128xf32>
    %162 = arith.addf %159, %161 : vector<16x128xf32>
    %163 = arith.negf %162 : vector<16x128xf32>
    %164 = math.exp %163 : vector<16x128xf32>
    %cst_83 = arith.constant 1.000000e+00 : f32
    %165 = vector.broadcast %cst_83 : f32 to vector<16x128xf32>
    %166 = arith.addf %165, %164 : vector<16x128xf32>
    %167 = arith.divf %165, %166 : vector<16x128xf32>
    %168 = arith.mulf %162, %167 : vector<16x128xf32>
    %169 = arith.truncf %168 : vector<16x128xf32> to vector<16x128xbf16>
    %c0_84 = arith.constant 0 : index
    %c16 = arith.constant 16 : index
    %c0_85 = arith.constant 0 : index
    %170 = vector.load %arg4[%c0_84, %c16, %c0_85] : memref<1x32x128xbf16, #tpu.memory_space<vmem>>, vector<1x16x128xbf16>
    %171 = vector.shape_cast %170 : vector<1x16x128xbf16> to vector<16x128xbf16>
    %172 = vector.shape_cast %169 : vector<16x128xbf16> to vector<1x16x128xbf16>
    tpu.vector_store %arg4[%c0_84, %c16, %c0_85], %172 {strides = array<i32>} : memref<1x32x128xbf16, #tpu.memory_space<vmem>>, vector<1x16x128xbf16>,
    return
  }
  func.func @transform_0(%arg0: i32) -> (i32, i32, i32, i32) {
    %c0_i32 = arith.constant 0 : i32
    %c0_i32_0 = arith.constant 0 : i32
    %c0_i32_1 = arith.constant 0 : i32
    %c0_i32_2 = arith.constant 0 : i32
    return %arg0, %c0_i32, %c0_i32_0, %c0_i32_1 : i32, i32, i32, i32
  }
  func.func @transform_1(%arg0: i32) -> (i32, i32, i32) {
    %c0_i32 = arith.constant 0 : i32
    %c0_i32_0 = arith.constant 0 : i32
    %c0_i32_1 = arith.constant 0 : i32
    %c0_i32_2 = arith.constant 0 : i32
    return %c0_i32, %c0_i32_0, %c0_i32_1 : i32, i32, i32
  }
  func.func @transform_2(%arg0: i32) -> (i32, i32) {
    %c0_i32 = arith.constant 0 : i32
    %c0_i32_0 = arith.constant 0 : i32
    %c0_i32_1 = arith.constant 0 : i32
    return %c0_i32, %c0_i32_0 : i32, i32
  }
  func.func @transform_3(%arg0: i32) -> (i32, i32, i32) {
    %c0_i32 = arith.constant 0 : i32
    %c0_i32_0 = arith.constant 0 : i32
    %c0_i32_1 = arith.constant 0 : i32
    return %arg0, %c0_i32, %c0_i32_0 : i32, i32, i32
  }
}

</mosaic_0001>

<bundles_post_ra>
// kernel: encoder_forward.2
= control target key start
LH: loop header
LB: loop body
LE: loop exit
PB: predicated region body
PF: predicated region fallthrough
CT: control target
= control target key end

     0   :  { %s2505_s12 = smov 0   ;;  %s2959_s0 = inlined_call_operand.vmem [shape: bf16[2,1,8,422], index: 0, kind: input, shape index: {}]   ;;  %s2960_s1 = inlined_call_operand.vmem [shape: bf16[9,32,8], index: 1, kind: input, shape index: {}]   ;;  %s2961_s2 = inlined_call_operand.vmem [shape: f32[32,3], index: 2, kind: input, shape index: {}]   ;;  %s2962_s3 = inlined_call_operand.vmem [shape: bf16[2,32,384], index: 3, kind: output, shape index: {}]  }
   0x1 LB: > { %s2026_s13 = sadd.s32 4294967295, %s2472_s12   ;;  %p2030_p0 = scmp.ge.s32.totalorder %s2472_s12, 1  ;;  %s2472_s12 = sphi %s2505_s12, %s13_s12  }
   0x2   : > { %p137_p1 = scmp.lt.s32.totalorder %s2472_s12, 3 }
   0x4   : > { %p138_p2 = pnand %p2030_p0, %p137_p1 }
   0x5   : > { %p161_p3 = scmp.lt.s32.totalorder (!%p138_p2), %s2026_s13, 1  ;;  %v2474_v0 = vmov (!%p138_p2), 0   ;;  %s2475_s18 = smov (!%p138_p2), 127   ;;  %vm212_vm0 = vcmask (!%p138_p2), 1039360   ;;  %vm223_vm1 = vcmask (!%p138_p2), 1043456   ;;  %v2395_v14 = vld [vmem:[%s2960_s1 + $0x10] sm:$0xff] (!%p138_p2)  }
   0x6   : > { %141 = sbr.rel (%p138_p2) target bundleno = 770 (0x302), region = 32  ;;  %265 = vmatprep.mubr.bf16.mxu1 (!%p138_p2), %v2474_v0  ;;  %539 = vmatprep.mubr.bf16.mxu0 (!%p138_p2), %v2474_v0  ;;  %s2476_s19 = smov (!%p138_p2), 126   ;;  %vm488_vm2 = vcmask (!%p138_p2), 1031168   ;;  %v2555_v15 = vld [vmem:[%s2961_s2 + $0x10] sm:$0xff] (!%p138_p2)  ;;  %v2560_v16 = vld [vmem:[%s2961_s2] sm:$0xff] (!%p138_p2)  ;;  %vm216_vm3 = vcmask (!%p138_p2), 64512  }
   0x7   : > { %2386 = vset.pattern.permute.xlu1 (!%p138_p2), %v2474_v0  ;;  %2385 = vset.pattern.permute.xlu0 (!%p138_p2), %v2474_v0  ;;  %s2477_s20 = smov (!%p138_p2), 110   ;;  %s2478_s21 = smov (!%p138_p2), 109   ;;  %v2569_v21 = vld [vmem:[%s2961_s2 + $0x8] sm:$0xff] (!%p138_p2)  ;;  %v2576_v23 = vld [vmem:[%s2961_s2 + $0x18] sm:$0xff] (!%p138_p2)  ;;  %v2592_v29 = vld [vmem:[%s2960_s1 + $0x20] sm:$0xff] (!%p138_p2)   ;;  %vm644_vm4 = vcmask (!%p138_p2), 900096  }
   0x8   : > { %s2479_s22 = smov (!%p138_p2), 108   ;;  %s2480_s23 = smov (!%p138_p2), 92   ;;  %v2396_v28 = vld [vmem:[%s2960_s1 + $0x18] sm:$0xff] (!%p138_p2)   ;;  %v2609_v37 = vld [vmem:[%s2960_s1 + $0x28] sm:$0xff] (!%p138_p2)   ;;  %vm800_vm5 = vcmask (!%p138_p2), 891904   ;;  %v2400_v45 = vld [vmem:[%s2960_s1] sm:$0xff] (!%p138_p2)  }
   0x9   : > { %s2481_s24 = smov (!%p138_p2), 91   ;;  %s2482_s25 = smov (!%p138_p2), 90   ;;  %v2401_v46 = vld [vmem:[%s2960_s1 + $0x30] sm:$0xff] (!%p138_p2)   ;;  %vm956_vm6 = vcmask (!%p138_p2), 883712   ;;  %v2402_v54 = vld [vmem:[%s2960_s1 + $0x38] sm:$0xff] (!%p138_p2)   ;;  %v2403_v55 = vld [vmem:[%s2960_s1 + $0x8] sm:$0xff] (!%p138_p2)  }
   0xa   : > { %v2404_v58 = vld [vmem:[%s2960_s1 + $0x40] sm:$0xff] (!%p138_p2)   ;;  %vm1112_vm7 = vcmask (!%p138_p2), 752640   ;;  %vm1268_vm8 = vcmask (!%p138_p2), 744448   ;;  %vm1424_vm9 = vcmask (!%p138_p2), 736256  }
   0xd   : > { %s2976_s13 = smov (!%p161_p3, %s2026_s13), 1 }
   0xe   : > { %s2156_s14 = sshll.u32 %s2976_s13, 4 }
   0xf   : > { %s2521_s17 = scalar_lea.vmem %s2959_s0, %s2156_s14 }
  0x10   : > { %v183_v1 = vld [vmem:[%s2521_s17 + $0x8] sm:$0xff]  ;;  %v176_v2 = vld [vmem:[%s2521_s17] sm:$0xff] }
  0x11   : > { %v2042_v3 = vcombine.low %v183_v1, %v183_v1  ;;  %v2527_v4 = vcombine.low %v176_v2, %v176_v2  ;;  %v2529_v5 = vcombine.high %v176_v2, %v176_v2  ;;  %v2043_v6 = vcombine.high %v183_v1, %v183_v1  ;;  %v2399_v41 = vld [vmem:[%s2521_s17 + $0x8] ss:$0 sps:$4 sm:$0xff]  }
  0x12   : > { %v361_v48 = vsel %vm223_vm1, %v2399_v41, 0 }
  0x13   : > { %208 = vrot.lane.b32.xlu1 %v2042_v3, %s2475_s18  ;;  %204 = vrot.lane.b32.xlu0 %v2527_v4, %s2475_s18  ;;  %v355_v40 = vsel %vm223_vm1, %v2527_v4, 0 }
  0x17   : > { %210 = vrot.lane.b32.xlu1 %v2043_v6, %s2475_s18  ;;  %206 = vrot.lane.b32.xlu0 %v2529_v5, %s2475_s18 }
  0x1b   : > { %480 = vrot.lane.b32.xlu0 %v2527_v4, %s2476_s19  ;;  %482 = vrot.lane.b32.xlu1 %v2529_v5, %s2476_s19 }
  0x1f   : > { %484 = vrot.lane.b32.xlu0 %v2042_v3, %s2476_s19  ;;  %636 = vrot.lane.b32.xlu1 %v2527_v4, %s2477_s20 }
  0x23   : > { %640 = vrot.lane.b32.xlu1 %v2042_v3, %s2477_s20  ;;  %638 = vrot.lane.b32.xlu0 %v2529_v5, %s2477_s20 }
  0x27   : > { %794 = vrot.lane.b32.xlu1 %v2529_v5, %s2478_s21  ;;  %792 = vrot.lane.b32.xlu0 %v2527_v4, %s2478_s21 }
  0x2b   : > { %486 = vrot.lane.b32.xlu1 %v2043_v6, %s2476_s19  ;;  %796 = vrot.lane.b32.xlu0 %v2042_v3, %s2478_s21 }
  0x2f   : > { %642 = vrot.lane.b32.xlu0 %v2043_v6, %s2477_s20  ;;  %948 = vrot.lane.b32.xlu1 %v2527_v4, %s2479_s22 }
  0x33   : > { %950 = vrot.lane.b32.xlu0 %v2529_v5, %s2479_s22  ;;  %952 = vrot.lane.b32.xlu1 %v2042_v3, %s2479_s22 }
  0x37   : > { %798 = vrot.lane.b32.xlu0 %v2043_v6, %s2478_s21  ;;  %1104 = vrot.lane.b32.xlu1 %v2527_v4, %s2480_s23 }
  0x3b   : > { %1106 = vrot.lane.b32.xlu0 %v2529_v5, %s2480_s23  ;;  %1108 = vrot.lane.b32.xlu1 %v2042_v3, %s2480_s23 }
  0x3f   : > { %954 = vrot.lane.b32.xlu0 %v2043_v6, %s2479_s22  ;;  %1260 = vrot.lane.b32.xlu1 %v2527_v4, %s2481_s24 }
  0x43   : > { %1262 = vrot.lane.b32.xlu0 %v2529_v5, %s2481_s24  ;;  %1264 = vrot.lane.b32.xlu1 %v2042_v3, %s2481_s24 }
  0x47   : > { %1110 = vrot.lane.b32.xlu0 %v2043_v6, %s2480_s23  ;;  %1266 = vrot.lane.b32.xlu1 %v2043_v6, %s2481_s24  ;;  %s2351_s24 = smul.u32 48, %s2976_s13 }
  0x49   : > { %s2936_s27 = scalar_lea.vmem %s2962_s3, %s2351_s24 }
  0x4b   : > { %1416 = vrot.lane.b32.xlu0 %v2527_v4, %s2482_s25  ;;  %1418 = vrot.lane.b32.xlu1 %v2529_v5, %s2482_s25 }
  0x4f   : > { %1420 = vrot.lane.b32.xlu0 %v2042_v3, %s2482_s25  ;;  %1422 = vrot.lane.b32.xlu1 %v2043_v6, %s2482_s25  ;;  %v2405_v3 = vld [vmem:[%s2960_s1 + $0x48] sm:$0xff]  }
  0x53   : > { %1573 = vperm.xlu1 %2386, %v2555_v15   ;;  %1563 = vperm.xlu0 %2385, %v2560_v16  }
  0x57   : > { %1568 = vperm.xlu1 %2386, %v2569_v21   ;;  %1578 = vperm.xlu0 %2385, %v2576_v23  }
  0x85   : > { %v209_v7 = vpop.permute.xlu1 %208  ;;  %v205_v8 = vpop.permute.xlu0 %204 }
  0x89   : > { %v211_v9 = vpop.permute.xlu1 %210  ;;  %v207_v10 = vpop.permute.xlu0 %206 }
  0x8a   : > { %v214_v11 = vsel %vm212_vm0, %v207_v10, %v209_v7  ;;  %v213_v12 = vsel %vm212_vm0, %v205_v8, %v207_v10  ;;  %v215_v17 = vsel %vm212_vm0, %v209_v7, %v211_v9  ;;  %v2406_v8 = vld [vmem:[%s2960_s1 + $0x50] sm:$0xff]  }
  0x8b   : > { %2044 = vmatprep.subr.msk.bf16.mxu1 %vm223_vm1, %v214_v11  ;;  %v225_v13 = vsel %vm223_vm1, %v213_v12, 0  ;;  %v231_v22 = vsel %vm223_vm1, %v215_v17, 0 }
  0x8c   : > { %234 = vmatpush1.bf16.msra.mxu1 %v225_v13 }
  0x8d   : > { %2342 = vmatprep.subr.msk.bf16.mxu1 %vm223_vm1, %v215_v17  ;;  %v481_v18 = vpop.permute.xlu0 %480  ;;  %v483_v19 = vpop.permute.xlu1 %482  ;;  %v2407_v17 = vld [vmem:[%s2960_s1 + $0x58] sm:$0xff]  }
  0x8e   : > { %v489_v20 = vsel %vm488_vm2, %v481_v18, %v483_v19 }
  0x8f   : > { %2045 = vmatmul.mubr.msk.bf16.vlgmr.msra.gmra.mrb[0].mxu1 %vm216_vm3, %v2395_v14  ;;  %v499_v26 = vsel %vm223_vm1, %v489_v20, 0 }
  0x90   : > { %2193 = vmatpush3.bf16.msra.mxu1 %v231_v22  ;;  %275 = vmatprep.mubr.bf16.mxu1 %v2474_v0 }
  0x91   : > { %v485_v24 = vpop.permute.xlu0 %484  ;;  %v637_v25 = vpop.permute.xlu1 %636  ;;  %2052 = vmatprep.subr.msk.bf16.mxu1 %vm223_vm1, %v2529_v5 }
  0x92   : > { %v490_v27 = vsel %vm488_vm2, %v483_v19, %v485_v24 }
  0x93   : > { %2063 = vmatprep.subr.msk.bf16.mxu0 %vm223_vm1, %v490_v27 }
  0x94   : > { %508 = vmatpush1.bf16.msra.mxu0 %v499_v26 }
  0x95   : > { %v2594_v30 = vpop.permute.xlu1 %640  ;;  %v639_v31 = vpop.permute.xlu0 %638 }
  0x96   : > { %v645_v32 = vsel %vm644_vm4, %v637_v25, %v639_v31  ;;  %v646_v33 = vsel %vm644_vm4, %v639_v31, %v2594_v30  ;;  %v2408_v25 = vld [vmem:[%s2960_s1 + $0x60] sm:$0xff]  }
  0x97   : > { %2046 = vmatmul.mubr.msk.bf16.gmra.mrb[4].mxu1 %vm216_vm3, %v2396_v28  ;;  %2064 = vmatmul.mubr.msk.bf16.vlgmr.msra.gmra.mrb[0].mxu0 %vm216_vm3, %v2592_v29  ;;  %v655_v34 = vsel %vm223_vm1, %v645_v32, 0  ;;  %v2409_v32 = vld [vmem:[%s2960_s1 + $0x68] sm:$0xff]  }
  0x98   : > { %2194 = vmatprep.mubr.msk.bf16.mxu1 %vm216_vm3, %v2395_v14  ;;  %549 = vmatprep.mubr.bf16.mxu0 %v2474_v0 }
  0x99   : > { %v795_v35 = vpop.permute.xlu1 %794  ;;  %v793_v36 = vpop.permute.xlu0 %792  ;;  %2074 = vmatprep.subr.msk.bf16.mxu0 %vm223_vm1, %v646_v33  ;;  %v2410_v33 = vld [vmem:[%s2960_s1 + $0x70] sm:$0xff]  }
  0x9a   : > { %664 = vmatpush1.bf16.msra.mxu0 %v655_v34  ;;  %v801_v47 = vsel %vm800_vm5, %v793_v36, %v795_v35 }
  0x9b   : > { %v811_v50 = vsel %vm223_vm1, %v801_v47, 0 }
  0x9d   : > { %v487_v38 = vpop.permute.xlu1 %486  ;;  %v2611_v39 = vpop.permute.xlu0 %796 }
  0x9e   : > { %v802_v42 = vsel %vm800_vm5, %v795_v35, %v2611_v39  ;;  %v491_v52 = vsel %vm488_vm2, %v485_v24, %v487_v38  ;;  %v2411_v38 = vld [vmem:[%s2960_s1 + $0x78] sm:$0xff]  }
  0x9f   : > { %2195 = vmatmul.mubr.msk.bf16.vlgmr.msra.gmra.mrb[8].mxu1 %vm216_vm3, %v2396_v28  ;;  %2065 = vmatmul.mubr.msk.bf16.gmra.mrb[4].mxu0 %vm216_vm3, %v2609_v37  ;;  %v505_v61 = vsel %vm223_vm1, %v491_v52, 0 }
  0xa0   : > { %364 = vmatpush1.bf16.msra.mxu1 %v355_v40  ;;  %395 = vmatprep.mubr.bf16.mxu1 %v2474_v0 }
  0xa1   : > { %2343 = vmatprep.subr.msk.bf16.mxu1 %vm223_vm1, %v2399_v41  ;;  %695 = vmatprep.mubr.bf16.mxu0 %v2474_v0  ;;  %v949_v43 = vpop.permute.xlu1 %948  ;;  %v643_v44 = vpop.permute.xlu0 %642 }
  0xa2   : > { %2085 = vmatprep.subr.msk.bf16.mxu0 %vm223_vm1, %v802_v42  ;;  %v647_v1 = vsel %vm644_vm4, %v2594_v30, %v643_v44  ;;  %v2412_v42 = vld [vmem:[%s2960_s1 + $0x80] sm:$0xff]  }
  0xa3   : > { %v661_v7 = vsel %vm223_vm1, %v647_v1, 0 }
  0xa5   : > { %v2633_v49 = vpop.permute.xlu1 %952  ;;  %v951_v51 = vpop.permute.xlu0 %950 }
  0xa6   : > { %v958_v53 = vsel %vm956_vm6, %v951_v51, %v2633_v49  ;;  %v957_v59 = vsel %vm956_vm6, %v949_v43, %v951_v51  ;;  %v2413_v43 = vld [vmem:[%s2960_s1 + $0x88] sm:$0xff]  }
  0xa7   : > { %2053 = vmatmul.mubr.msk.bf16.vlgmr.msra.gmra.mrb[0].mxu1 %vm216_vm3, %v2400_v45  ;;  %2075 = vmatmul.mubr.msk.bf16.vlgmr.msra.gmra.mrb[0].mxu0 %vm216_vm3, %v2401_v46  ;;  %v967_v62 = vsel %vm223_vm1, %v957_v59, 0 }
  0xa8   : > { %2199 = vmatpush3.bf16.msra.mxu1 %v361_v48  ;;  %405 = vmatprep.mubr.bf16.mxu1 %v2474_v0 }
  0xa9   : > { %2344 = vmatprep.subr.msk.bf16.mxu1 %vm223_vm1, %v491_v52  ;;  %705 = vmatprep.mubr.bf16.mxu0 %v2474_v0  ;;  %v1105_v56 = vpop.permute.xlu1 %1104  ;;  %v799_v57 = vpop.permute.xlu0 %798 }
  0xaa   : > { %820 = vmatpush1.bf16.msra.mxu0 %v811_v50  ;;  %v803_v11 = vsel %vm800_vm5, %v2611_v39, %v799_v57 }
  0xab   : > { %2096 = vmatprep.subr.msk.bf16.mxu0 %vm223_vm1, %v958_v53  ;;  %v817_v22 = vsel %vm223_vm1, %v803_v11, 0  ;;  %v1593_v53 = vlaneseq }
  0xad   : > { %v1109_v60 = vpop.permute.xlu1 %1108  ;;  %v1107_v63 = vpop.permute.xlu0 %1106 }
  0xae   : > { %v1114_v2 = vsel %vm1112_vm7, %v1107_v63, %v1109_v60  ;;  %v1113_v6 = vsel %vm1112_vm7, %v1105_v56, %v1107_v63 }
  0xaf   : > { %2076 = vmatmul.mubr.msk.bf16.gmra.mrb[4].mxu0 %vm216_vm3, %v2402_v54  ;;  %2054 = vmatmul.mubr.msk.bf16.gmra.mrb[4].mxu1 %vm216_vm3, %v2403_v55  ;;  %v1123_v12 = vsel %vm223_vm1, %v1113_v6, 0 }
  0xb0   : > { %2200 = vmatprep.mubr.msk.bf16.mxu1 %vm216_vm3, %v2400_v45  ;;  %851 = vmatprep.mubr.bf16.mxu0 %v2474_v0  ;;  %v2483_v45 = vmov 1  }
  0xb1   : > { %v1261_v4 = vpop.permute.xlu1 %1260  ;;  %v955_v5 = vpop.permute.xlu0 %954  ;;  %2388 = vset.pattern.permute.xlu1 %v2483_v45  ;;  %2387 = vset.pattern.permute.xlu0 %v2483_v45 }
  0xb2   : > { %v959_v20 = vsel %vm956_vm6, %v2633_v49, %v955_v5 }
  0xb3   : > { %v973_v31 = vsel %vm223_vm1, %v959_v20, 0 }
  0xb5   : > { %v1263_v9 = vpop.permute.xlu0 %1262  ;;  %v1265_v10 = vpop.permute.xlu1 %1264 }
  0xb6   : > { %v1270_v13 = vsel %vm1268_vm8, %v1263_v9, %v1265_v10  ;;  %v1269_v24 = vsel %vm1268_vm8, %v1261_v4, %v1263_v9 }
  0xb7   : > { %2201 = vmatmul.mubr.msk.bf16.vlgmr.msra.gmra.mrb[8].mxu1 %vm216_vm3, %v2403_v55  ;;  %2086 = vmatmul.mubr.msk.bf16.vlgmr.msra.gmra.mrb[0].mxu0 %vm216_vm3, %v2404_v58  ;;  %v1279_v28 = vsel %vm223_vm1, %v1269_v24, 0 }
  0xb8   : > { %2205 = vmatpush3.bf16.msra.mxu1 %v505_v61  ;;  %861 = vmatprep.mubr.bf16.mxu0 %v2474_v0 }
  0xb9   : > { %2345 = vmatprep.subr.msk.bf16.mxu1 %vm223_vm1, %v647_v1  ;;  %2206 = vmatprep.mubr.msk.bf16.mxu1 %vm216_vm3, %v2592_v29  ;;  %v1111_v14 = vpop.permute.xlu0 %1110  ;;  %v1267_v18 = vpop.permute.xlu1 %1266 }
  0xba   : > { %976 = vmatpush1.bf16.msra.mxu0 %v967_v62  ;;  %v1115_v30 = vsel %vm1112_vm7, %v1109_v60, %v1111_v14  ;;  %v1271_v35 = vsel %vm1268_vm8, %v1265_v10, %v1267_v18 }
  0xbb   : > { %2107 = vmatprep.subr.msk.bf16.mxu0 %vm223_vm1, %v1114_v2  ;;  %v1129_v36 = vsel %vm223_vm1, %v1115_v30, 0  ;;  %v1285_v40 = vsel %vm223_vm1, %v1271_v35, 0 }
  0xbd   : > { %v1417_v19 = vpop.permute.xlu0 %1416  ;;  %v1419_v26 = vpop.permute.xlu1 %1418 }
  0xbe   : > { %v1425_v34 = vsel %vm1424_vm9, %v1417_v19, %v1419_v26 }
  0xbf   : > { %2087 = vmatmul.mubr.msk.bf16.gmra.mrb[4].mxu0 %vm216_vm3, %v2405_v3 }
  0xc0   : > { %1007 = vmatprep.mubr.bf16.mxu0 %v2474_v0 }
  0xc1   : > { %v1421_v27 = vpop.permute.xlu0 %1420  ;;  %v1423_v39 = vpop.permute.xlu1 %1422 }
  0xc2   : > { %v1426_v29 = vsel %vm1424_vm9, %v1419_v26, %v1421_v27  ;;  %v1427_v41 = vsel %vm1424_vm9, %v1421_v27, %v1423_v39 }
  0xc3   : > { %2207 = vmatmul.mubr.msk.bf16.vlgmr.msra.gmra.mrb[8].mxu1 %vm216_vm3, %v2609_v37  ;;  %v1435_v37 = vsel %vm223_vm1, %v1425_v34, 0  ;;  %v1441_v44 = vsel %vm223_vm1, %v1427_v41, 0 }
  0xc4   : > { %2211 = vmatpush3.bf16.msra.mxu1 %v661_v7  ;;  %2212 = vmatprep.mubr.msk.bf16.mxu1 %vm216_vm3, %v2401_v46 }
  0xc5   : > { %2346 = vmatprep.subr.msk.bf16.mxu1 %vm223_vm1, %v803_v11 }
  0xc7   : > { %2097 = vmatmul.mubr.msk.bf16.vlgmr.msra.gmra.mrb[0].mxu0 %vm216_vm3, %v2406_v8 }
  0xc8   : > { %1017 = vmatprep.mubr.bf16.mxu0 %v2474_v0  ;;  %1132 = vmatpush1.bf16.msra.mxu0 %v1123_v12 }
  0xc9   : > { %2118 = vmatprep.subr.msk.bf16.mxu0 %vm223_vm1, %v1270_v13 }
  0xcf   : > { %2098 = vmatmul.mubr.msk.bf16.gmra.mrb[4].mxu0 %vm216_vm3, %v2407_v17  ;;  %2213 = vmatmul.mubr.msk.bf16.vlgmr.msra.gmra.mrb[8].mxu1 %vm216_vm3, %v2402_v54  ;;  %v1594_v54 = vand.u32 127, %v1593_v53 }
  0xd0   : > { %2217 = vmatpush3.bf16.msra.mxu1 %v817_v22  ;;  %1163 = vmatprep.mubr.bf16.mxu0 %v2474_v0 }
  0xd1   : > { %2347 = vmatprep.subr.msk.bf16.mxu1 %vm223_vm1, %v959_v20  ;;  %2218 = vmatprep.mubr.msk.bf16.mxu1 %vm216_vm3, %v2404_v58  ;;  %v1595_v55 = vadd.s32 128, %v1594_v54  ;;  %v2757_v56 = vadd.s32 256, %v1594_v54  ;;  %v2759_v57 = vmul.u32.u64.low 3817748708, %v1594_v54  ;;  %v2760_v58 = vmul.u32.u64.high 3817748708, %v1594_v54, %v2759_v57 }
  0xd3   : > { %v2762_v59 = vmul.u32.u64.low 3817748708, %v1595_v55  ;;  %v2763_v60 = vmul.u32.u64.high 3817748708, %v1595_v55, %v2762_v59  ;;  %v2766_v61 = vmul.u32.u64.low 3817748708, %v2757_v56  ;;  %v2767_v62 = vmul.u32.u64.high 3817748708, %v2757_v56, %v2766_v61 }
  0xd4   : > { %v1606_v63 = vshrl.u32 %v2760_v58, 4  ;;  %vm1599_vm5 = vcmp.lt.s32.totalorder %v2757_v56, 288 }
  0xd5   : > { %v1617_v1 = vshrl.u32 %v2763_v60, 4  ;;  %v1628_v2 = vshrl.u32 %v2767_v62, 4 }
  0xd7   : > { %2108 = vmatmul.mubr.msk.bf16.vlgmr.msra.gmra.mrb[0].mxu0 %vm216_vm3, %v2408_v25  ;;  %v1618_v4 = vmul.u32 18, %v1617_v1  ;;  %v1629_v6 = vmul.u32 18, %v1628_v2 }
  0xd8   : > { %1173 = vmatprep.mubr.bf16.mxu0 %v2474_v0  ;;  %1288 = vmatpush1.bf16.msra.mxu0 %v1279_v28 }
  0xd9   : > { %2129 = vmatprep.subr.msk.bf16.mxu0 %vm223_vm1, %v1426_v29  ;;  %v1619_v12 = vsub.s32 %v1595_v55, %v1618_v4  ;;  %v1630_v18 = vsub.s32 %v2757_v56, %v1629_v6 }
  0xdb   : > { %2219 = vmatmul.mubr.msk.bf16.vlgmr.msra.gmra.mrb[8].mxu1 %vm216_vm3, %v2405_v3  ;;  %v1607_v3 = vmul.u32 18, %v1606_v63  ;;  %vm1634_vm12 = vcmp.ne.s32.totalorder %v1619_v12, 0  ;;  %vm1637_vm13 = vcmp.lt.s32.totalorder %v1619_v12, 0  ;;  %v1643_v22 = vadd.s32 18, %v1619_v12 }
  0xdc   : > { %2223 = vmatpush3.bf16.msra.mxu1 %v973_v31  ;;  %2224 = vmatprep.mubr.msk.bf16.mxu1 %vm216_vm3, %v2406_v8  ;;  %vm1635_vm15 = vcmp.ne.s32.totalorder %v1630_v18, 0  ;;  %vm1638_vm0 = vcmp.lt.s32.totalorder %v1630_v18, 0  ;;  %v1644_v31 = vadd.s32 18, %v1630_v18 }
  0xdd   : > { %2348 = vmatprep.subr.msk.bf16.mxu1 %vm223_vm1, %v1115_v30  ;;  %v1608_v9 = vsub.s32 %v1594_v54, %v1607_v3  ;;  %vm2781_vm2 = vmand %vm1638_vm0, %vm1635_vm15 }
  0xdf   : > { %2109 = vmatmul.mubr.msk.bf16.gmra.mrb[4].mxu0 %vm216_vm3, %v2409_v32  ;;  %vm1633_vm10 = vcmp.ne.s32.totalorder %v1608_v9, 0  ;;  %vm1636_vm11 = vcmp.lt.s32.totalorder %v1608_v9, 0  ;;  %v1642_v20 = vadd.s32 18, %v1608_v9 }
  0xe0   : > { %1319 = vmatprep.mubr.bf16.mxu0 %v2474_v0  ;;  %vm2773_vm14 = vmand %vm1636_vm11, %vm1633_vm10 }
  0xe7   : > { %2225 = vmatmul.mubr.msk.bf16.vlgmr.msra.gmra.mrb[8].mxu1 %vm216_vm3, %v2407_v17  ;;  %2119 = vmatmul.mubr.msk.bf16.vlgmr.msra.gmra.mrb[0].mxu0 %vm216_vm3, %v2410_v33 }
  0xe8   : > { %2229 = vmatpush3.bf16.msra.mxu1 %v1129_v36  ;;  %1329 = vmatprep.mubr.bf16.mxu0 %v2474_v0  ;;  %v1645_v36 = vsel %vm2773_vm14, %v1642_v20, %v1608_v9 }
  0xe9   : > { %2349 = vmatprep.subr.msk.bf16.mxu1 %vm223_vm1, %v1271_v35  ;;  %2230 = vmatprep.mubr.msk.bf16.mxu1 %vm216_vm3, %v2408_v25  ;;  %v1574_v25 = vpop.permute.xlu1 %1573 }
  0xea   : > { %1444 = vmatpush1.bf16.msra.mxu0 %v1435_v37 }
  0xef   : > { %2120 = vmatmul.mubr.msk.bf16.gmra.mrb[4].mxu0 %vm216_vm3, %v2411_v38 }
  0xf0   : > { %1475 = vmatprep.mubr.bf16.mxu0 %v2474_v0 }
  0xf3   : > { %2231 = vmatmul.mubr.msk.bf16.vlgmr.msra.gmra.mrb[8].mxu1 %vm216_vm3, %v2409_v32  ;;  %v1564_v32 = vpop.permute.xlu0 %1563 }
  0xf4   : > { %2235 = vmatpush3.bf16.msra.mxu1 %v1285_v40  ;;  %2236 = vmatprep.mubr.msk.bf16.mxu1 %vm216_vm3, %v2410_v33 }
  0xf5   : > { %2350 = vmatprep.subr.msk.bf16.mxu1 %vm223_vm1, %v1427_v41  ;;  %vm2777_vm1 = vmand %vm1637_vm13, %vm1634_vm12 }
  0xf6   : > { %v1646_v37 = vsel %vm2777_vm1, %v1643_v22, %v1619_v12 }
  0xf7   : > { %2130 = vmatmul.mubr.msk.bf16.vlgmr.msra.gmra.mrb[0].mxu0 %vm216_vm3, %v2412_v42  ;;  %vm2803_vm4 = vcmp.lt.s32.totalorder %v1646_v37, 16 }
  0xf8   : > { %1485 = vmatprep.mubr.bf16.mxu0 %v2474_v0 }
  0xff   : > { %2237 = vmatmul.mubr.msk.bf16.vlgmr.msra.gmra.mrb[8].mxu1 %vm216_vm3, %v2411_v38  ;;  %2131 = vmatmul.mubr.msk.bf16.gmra.mrb[4].mxu0 %vm216_vm3, %v2413_v43 }
 0x100   : > { %2241 = vmatpush3.bf16.msra.mxu1 %v1441_v44  ;;  %2242 = vmatprep.mubr.msk.bf16.mxu1 %vm216_vm3, %v2412_v42 }
 0x10b   : > { %2243 = vmatmul.mubr.msk.bf16.vlgmr.msra.gmra.mrb[8].mxu1 %vm216_vm3, %v2413_v43  ;;  %v1647_v43 = vsel %vm2781_vm2, %v1644_v31, %v1630_v18  ;;  %vm2799_vm3 = vcmp.lt.s32.totalorder %v1645_v36, 16 }
 0x10c   : > { %vm1650_vm6 = vcmp.lt.s32.totalorder %v1647_v43, 16 }
 0x10d   : > { %vm2826_vm7 = vmand %vm1599_vm5, %vm1650_vm6 }
 0x17a   : > { %v397_v46 = vpop.f32.mrb[0].mxu1 }
 0x17b   : > { %v399_v0 = vpop.f32.mrb[1].mxu1 }
 0x17c   : > { %v401_v47 = vpop.f32.mrb[2].mxu1 }
 0x17d   : > { %v403_v48 = vpop.f32.mrb[3].mxu1 }
 0x182   : > { %v407_v49 = vpop.f32.mrb[4].mxu1 }
 0x183   : > { %v409_v50 = vpop.f32.mrb[5].mxu1 }
 0x184   : > { %v411_v51 = vpop.f32.mrb[6].mxu1 }
 0x185   : > { %v413_v52 = vpop.f32.mrb[7].mxu1 }
 0x1ca   : > { %v1477_v5 = vpop.f32.mrb[0].mxu0 }
 0x1cb   : > { %v2246_v7 = vadd.f32 %v1477_v5, %v397_v46  ;;  %v1479_v8 = vpop.f32.mrb[1].mxu0  ;;  %v1569_v46 = vpop.permute.xlu1 %1568 }
 0x1cc   : > { %v2247_v10 = vadd.f32 %v1479_v8, %v399_v0  ;;  %v1481_v11 = vpop.f32.mrb[2].mxu0  ;;  %v1579_v0 = vpop.permute.xlu0 %1578 }
 0x1cd   : > { %v2248_v13 = vadd.f32 %v1481_v11, %v401_v47  ;;  %v1483_v14 = vpop.f32.mrb[3].mxu0  ;;  %v2793_v41 = vadd.f32 %v2246_v7, %v1564_v32 }
 0x1ce   : > { %v2249_v17 = vadd.f32 %v1483_v14, %v403_v48  ;;  %v2795_v42 = vadd.f32 %v2247_v10, %v1564_v32 }
 0x1d2   : > { %v1487_v24 = vpop.f32.mrb[4].mxu0 }
 0x1d3   : > { %v2250_v27 = vadd.f32 %v1487_v24, %v407_v49  ;;  %v1489_v28 = vpop.f32.mrb[5].mxu0  ;;  %v1660_v49 = vsel %vm2799_vm3, %v2793_v41, 0.0 }
 0x1d4   : > { %v2251_v29 = vadd.f32 %v1489_v28, %v409_v50  ;;  %v1491_v30 = vpop.f32.mrb[6].mxu0  ;;  %v1661_v50 = vsel %vm2803_vm4, %v2795_v42, 0.0  ;;  %v1681_v58 = vmul.f32 %v1660_v49, %v1660_v49 }
 0x1d5   : > { %v2252_v33 = vadd.f32 %v1491_v30, %v411_v51  ;;  %v1493_v34 = vpop.f32.mrb[7].mxu0  ;;  %v2789_v39 = vadd.f32 %v2250_v27, %v1574_v25  ;;  %v2820_v51 = vadd.f32 %v2248_v13, %v1569_v46  ;;  %v1682_v59 = vmul.f32 %v1661_v50, %v1661_v50 }
 0x1d6   : > { %v2253_v38 = vadd.f32 %v1493_v34, %v413_v52  ;;  %v2791_v40 = vadd.f32 %v2251_v29, %v1574_v25  ;;  %v2822_v52 = vadd.f32 %v2249_v17, %v1569_v46  ;;  %v1666_v2 = vadd.f32 %v1661_v50, %v1660_v49 }
 0x1d7   : > { %v1816_v47 = vsel %vm2799_vm3, %v2789_v39, 0.0  ;;  %v2824_v53 = vadd.f32 %v2252_v33, %v1579_v0  ;;  %v1663_v62 = vsel %vm2799_vm3, %v2820_v51, 0.0  ;;  %v1687_v18 = vadd.f32 %v1682_v59, %v1681_v58 }
 0x1d8   : > { %v1817_v48 = vsel %vm2803_vm4, %v2791_v40, 0.0  ;;  %v1837_v54 = vmul.f32 %v1816_v47, %v1816_v47  ;;  %v2835_v63 = vadd.f32 %v2253_v38, %v1579_v0  ;;  %v1664_v8 = vsel %vm2803_vm4, %v2822_v52, 0.0 }
 0x1d9   : > { %v1838_v55 = vmul.f32 %v1817_v48, %v1817_v48  ;;  %v1819_v4 = vsel %vm2799_vm3, %v2824_v53, 0.0  ;;  %v1822_v6 = vadd.f32 %v1817_v48, %v1816_v47  ;;  %v1685_v29 = vmul.f32 %v1664_v8, %v1664_v8 }
 0x1da   : > { %v1820_v19 = vsel %vm2803_vm4, %v2835_v63, 0.0  ;;  %v1840_v20 = vmul.f32 %v1819_v4, %v1819_v4  ;;  %v2484_v48 = vmov 2  }
 0x1db   : > { %v1843_v10 = vadd.f32 %v1838_v55, %v1837_v54  ;;  %v1841_v33 = vmul.f32 %v1820_v19, %v1820_v19 }
 0x1de   : > { %v2244_v57 = vpop.f32.mrb[8].mxu1 }
 0x1df   : > { %v2830_v60 = vadd.f32 %v2244_v57, %v1574_v25  ;;  %v1530_v61 = vpop.f32.mrb[9].mxu1  ;;  %v1684_v25 = vmul.f32 %v1663_v62, %v1663_v62 }
 0x1e0   : > { %v2837_v1 = vadd.f32 %v1564_v32, %v1530_v61  ;;  %v2245_v3 = vpop.f32.mrb[10].mxu1 }
 0x1e1   : > { %v1818_v5 = vsel %vm2826_vm7, %v2830_v60, 0.0  ;;  %v1533_v7 = vpop.f32.mrb[11].mxu1  ;;  %v2856_v24 = vadd.f32 %v2245_v3, %v1579_v0 }
 0x1e2   : > { %v1839_v9 = vmul.f32 %v1818_v5, %v1818_v5  ;;  %v1662_v11 = vsel %vm2826_vm7, %v2837_v1, 0.0  ;;  %v2851_v12 = vadd.f32 %v1569_v46, %v1533_v7  ;;  %v1823_v13 = vadd.f32 %v1822_v6, %v1818_v5 }
 0x1e3   : > { %v1667_v14 = vadd.f32 %v1666_v2, %v1662_v11  ;;  %v1683_v17 = vmul.f32 %v1662_v11, %v1662_v11  ;;  %v1821_v35 = vsel %vm2826_vm7, %v2856_v24, 0.0 }
 0x1e4   : > { %v1844_v22 = vadd.f32 %v1843_v10, %v1839_v9  ;;  %v1665_v28 = vsel %vm2826_vm7, %v2851_v12, 0.0  ;;  %v1824_v34 = vadd.f32 %v1823_v13, %v1819_v4  ;;  %v1842_v45 = vmul.f32 %v1821_v35, %v1821_v35 }
 0x1e5   : > { %v1688_v26 = vadd.f32 %v1687_v18, %v1683_v17  ;;  %v1668_v27 = vadd.f32 %v1667_v14, %v1663_v62  ;;  %v1686_v37 = vmul.f32 %v1665_v28, %v1665_v28 }
 0x1e6   : > { %v1845_v30 = vadd.f32 %v1844_v22, %v1840_v20  ;;  %v1825_v46 = vadd.f32 %v1824_v34, %v1820_v19 }
 0x1e7   : > { %v1669_v31 = vadd.f32 %v1668_v27, %v1664_v8  ;;  %v1689_v32 = vadd.f32 %v1688_v26, %v1684_v25 }
 0x1e8   : > { %v1846_v43 = vadd.f32 %v1845_v30, %v1841_v33  ;;  %v1826_v47 = vadd.f32 %v1825_v46, %v1821_v35 }
 0x1e9   : > { %v1670_v36 = vadd.f32 %v1669_v31, %v1665_v28  ;;  %v1690_v38 = vadd.f32 %v1689_v32, %v1685_v29 }
 0x1ea   : > { %v1847_v0 = vadd.f32 %v1846_v43, %v1842_v45 }
 0x1eb   : > { %1671 = vadd.xlane.f32.xlu1 %v1670_v36  ;;  %v1691_v44 = vadd.f32 %v1690_v38, %v1686_v37 }
 0x1ed   : > { %1692 = vadd.xlane.f32.xlu0 %v1691_v44 }
 0x1ef   : > { %1848 = vadd.xlane.f32.xlu1 %v1847_v0 }
 0x1f1   : > { %1827 = vadd.xlane.f32.xlu0 %v1826_v47 }
 0x200   : > { %1727 = vperm.xlu1 %2388, %v2569_v21  }
 0x204   : > { %1878 = vperm.xlu1 %2388, %v2555_v15  }
 0x207   : > { %1723 = vperm.xlu0 %2387, %v2560_v16  }
 0x208   : > { %1882 = vperm.xlu1 %2388, %v2576_v23  }
 0x20b   : > { %2390 = vset.pattern.permute.xlu0 %v2484_v48 }
 0x20c   : > { %2389 = vset.pattern.permute.xlu1 %v2484_v48 }
 0x20d   : > { %1737 = vperm.xlu1 %2389, %v2560_v16  }
 0x211   : > { %1741 = vperm.xlu1 %2389, %v2569_v21  }
 0x215   : > { %1892 = vperm.xlu1 %2389, %v2555_v15  }
 0x219   : > { %1896 = vperm.xlu1 %2389, %v2576_v23  }
 0x278   : > { %v1672_v49 = vpop.xlane.xlu1 %1671 }
 0x279   : > { %v1673_v50 = vrot.slane %v1672_v49, 4 }
 0x27a   : > { %v1693_v54 = vpop.xlane.xlu0 %1692 }
 0x27b   : > { %v1674_v55 = vadd.f32 %v1673_v50, %v1672_v49  ;;  %v1694_v57 = vrot.slane %v1693_v54, 4 }
 0x27c   : > { %v1849_v56 = vpop.xlane.xlu1 %1848 }
 0x27d   : > { %v1675_v58 = vrot.slane %v1674_v55, 2  ;;  %v1695_v59 = vadd.f32 %v1694_v57, %v1693_v54  ;;  %v1850_v61 = vrot.slane %v1849_v56, 4 }
 0x27e   : > { %v1828_v62 = vpop.xlane.xlu0 %1827 }
 0x27f   : > { %v1696_v2 = vrot.slane %v1695_v59, 2  ;;  %v1851_v3 = vadd.f32 %v1850_v61, %v1849_v56  ;;  %v1829_v4 = vrot.slane %v1828_v62, 4  ;;  %v1676_v16 = vadd.f32 %v1675_v58, %v1674_v55 }
 0x280   : > { %v1728_v19 = vpop.permute.xlu1 %1727 }
 0x281   : > { %v1852_v5 = vrot.slane %v1851_v3, 2  ;;  %v1830_v21 = vadd.f32 %v1829_v4, %v1828_v62  ;;  %v1677_v6 = vrot.slane %v1676_v16, 1  ;;  %v1697_v15 = vadd.f32 %v1696_v2, %v1695_v59 }
 0x283   : > { %v1831_v7 = vrot.slane %v1830_v21, 2  ;;  %v1678_v23 = vadd.f32 %v1677_v6, %v1676_v16  ;;  %v1698_v8 = vrot.slane %v1697_v15, 1  ;;  %v1853_v9 = vadd.f32 %v1852_v5, %v1851_v3 }
 0x284   : > { %v2872_v25 = vpop.permute.xlu1 %1878 }
 0x285   : > { %2358 = vpush %v1678_v23  ;;  %v1699_v10 = vadd.f32 %v1698_v8, %v1697_v15  ;;  %v1832_v11 = vadd.f32 %v1831_v7, %v1830_v21  ;;  %v1854_v13 = vrot.slane %v1853_v9, 1 }
 0x286   : > { %v1724_v54 = vpop.permute.xlu0 %1723 }
 0x287   : > { %2360 = vpush %v1699_v10  ;;  %v1833_v14 = vrot.slane %v1832_v11, 1  ;;  %v1855_v18 = vadd.f32 %v1854_v13, %v1853_v9 }
 0x288   : > { %v1883_v34 = vpop.permute.xlu1 %1882 }
 0x289   : > { %v1834_v17 = vadd.f32 %v1833_v14, %v1832_v11 }
 0x28b   : > { %2362 = vpush %v1834_v17 }
 0x28c   : > { %2364 = vpush %v1855_v18  ;;  %v2874_v44 = vpop.permute.xlu1 %1737 }
 0x290   : > { %v1742_v48 = vpop.permute.xlu1 %1741 }
 0x294   : > { %v1893_v6 = vpop.permute.xlu1 %1892 }
 0x2b6   : > { %s2359_s20 = spop %2358 }
 0x2b7   : > { %v1680_v20 = vstv %s2359_s20 }
 0x2b8   : > { %v1703_v22 = vmul.f32 0.00024414063, %v1680_v20  ;;  %s2361_s21 = spop %2360 }
 0x2b9   : > { %v1701_v26 = vstv %s2361_s21 }
 0x2ba   : > { %v1704_v27 = vmul.f32 0.00024414063, %v1701_v26  ;;  %v1705_v28 = vmul.f32 %v1703_v22, %v1703_v22  ;;  %v1711_v46 = vsub.f32 %v2820_v51, %v1703_v22  ;;  %v1712_v0 = vsub.f32 %v2822_v52, %v1703_v22 }
 0x2bb   : > { %v1713_v47 = vsub.f32 %v2851_v12, %v1703_v22  ;;  %v1708_v49 = vsub.f32 %v2793_v41, %v1703_v22  ;;  %v1709_v55 = vsub.f32 %v2795_v42, %v1703_v22  ;;  %v1710_v57 = vsub.f32 %v2837_v1, %v1703_v22 }
 0x2bc   : > { %v1706_v29 = vsub.f32 %v1704_v27, %v1705_v28  ;;  %s2363_s22 = spop %2362 }
 0x2bd   : > { %v1836_v30 = vstv %s2363_s22  ;;  %s2365_s23 = spop %2364 }
 0x2be   : > { %v1707_v31 = vmax.f32 %v1706_v29, 0.0  ;;  %v1858_v32 = vmul.f32 0.00024414063, %v1836_v30  ;;  %v1857_v33 = vstv %s2365_s23  ;;  %v1897_v29 = vpop.permute.xlu1 %1896 }
 0x2bf   : > { %v1859_v36 = vmul.f32 0.00024414063, %v1857_v33 }
 0x2c0   : > { %v1714_v35 = vadd.f32 1e-05, %v1707_v31  ;;  %v1860_v37 = vmul.f32 %v1858_v32, %v1858_v32  ;;  %v1863_v12 = vsub.f32 %v2789_v39, %v1858_v32  ;;  %v1864_v41 = vsub.f32 %v2791_v40, %v1858_v32 }
 0x2c1   : > { %v1865_v16 = vsub.f32 %v2830_v60, %v1858_v32  ;;  %v1866_v42 = vsub.f32 %v2824_v53, %v1858_v32  ;;  %v1867_v23 = vsub.f32 %v2835_v63, %v1858_v32  ;;  %v1868_v39 = vsub.f32 %v2856_v24, %v1858_v32 }
 0x2c2   : > { %2414 = vrsqrt.f32 %v1714_v35  ;;  %v1861_v38 = vsub.f32 %v1859_v36, %v1860_v37 }
 0x2c4   : > { %v1862_v43 = vmax.f32 %v1861_v38, 0.0 }
 0x2c6   : > { %v1869_v45 = vadd.f32 1e-05, %v1862_v43 }
 0x2c8   : > { %2416 = vrsqrt.f32 %v1869_v45 }
 0x2cc   : > { %v2415_v50 = vpop.eup %2414 }
 0x2cd   : > { %v1719_v56 = vmul.f32 %v2415_v50, %v1711_v46  ;;  %v1720_v58 = vmul.f32 %v2415_v50, %v1712_v0  ;;  %v1721_v59 = vmul.f32 %v2415_v50, %v1713_v47  ;;  %v1716_v61 = vmul.f32 %v2415_v50, %v1708_v49 }
 0x2ce   : > { %v1717_v62 = vmul.f32 %v2415_v50, %v1709_v55  ;;  %v1718_v2 = vmul.f32 %v2415_v50, %v1710_v57 }
 0x2cf   : > { %v1733_v51 = vmul.f32 %v1728_v19, %v1719_v56  ;;  %v1734_v3 = vmul.f32 %v1728_v19, %v1720_v58  ;;  %v1735_v52 = vmul.f32 %v1728_v19, %v1721_v59  ;;  %v1730_v4 = vmul.f32 %v1724_v54, %v1716_v61 }
 0x2d0   : > { %v1731_v40 = vmul.f32 %v1724_v54, %v1717_v62  ;;  %v1732_v8 = vmul.f32 %v1724_v54, %v1718_v2 }
 0x2d1   : > { %v2886_v5 = vadd.f32 %v1742_v48, %v1733_v51  ;;  %v2888_v1 = vadd.f32 %v1742_v48, %v1734_v3  ;;  %v2890_v21 = vadd.f32 %v1742_v48, %v1735_v52  ;;  %v2893_v15 = vadd.f32 %v2874_v44, %v1730_v4 }
 0x2d2   : > { %v2417_v7 = vpop.eup %2416  ;;  %v2926_v46 = vadd.f32 %v2874_v44, %v1732_v8 }
 0x2d3   : > { %v2137_v60 = vmul.f32 -1.442695, %v2886_v5  ;;  %v2138_v53 = vmul.f32 -1.442695, %v2888_v1  ;;  %v2139_v9 = vmul.f32 -1.442695, %v2890_v21  ;;  %v1871_v10 = vmul.f32 %v2417_v7, %v1863_v12 }
 0x2d4   : > { %v1872_v11 = vmul.f32 %v2417_v7, %v1864_v41  ;;  %v1873_v13 = vmul.f32 %v2417_v7, %v1865_v16  ;;  %v1874_v14 = vmul.f32 %v2417_v7, %v1866_v42  ;;  %v1875_v17 = vmul.f32 %v2417_v7, %v1867_v23 }
 0x2d5   : > { %2418 = vpow2.f32 %v2137_v60  ;;  %v1885_v18 = vmul.f32 %v2872_v25, %v1871_v10  ;;  %v1876_v19 = vmul.f32 %v2417_v7, %v1868_v39  ;;  %v2134_v63 = vmul.f32 -1.442695, %v2893_v15 }
 0x2d6   : > { %2420 = vpow2.f32 %v2138_v53  ;;  %v1886_v24 = vmul.f32 %v2872_v25, %v1872_v11  ;;  %v1887_v20 = vmul.f32 %v2872_v25, %v1873_v13  ;;  %v1888_v22 = vmul.f32 %v1883_v34, %v1874_v14 }
 0x2d7   : > { %2422 = vpow2.f32 %v2139_v9  ;;  %v2904_v26 = vadd.f32 %v1893_v6, %v1885_v18  ;;  %v1889_v27 = vmul.f32 %v1883_v34, %v1875_v17  ;;  %v1890_v28 = vmul.f32 %v1883_v34, %v1876_v19 }
 0x2d8   : > { %v2906_v30 = vadd.f32 %v1893_v6, %v1886_v24  ;;  %v2908_v31 = vadd.f32 %v1893_v6, %v1887_v20  ;;  %v2910_v32 = vadd.f32 %v1897_v29, %v1888_v22  ;;  %2424 = vpow2.f32 %v2134_v63 }
 0x2d9   : > { %v2144_v33 = vmul.f32 -1.442695, %v2904_v26  ;;  %v2913_v35 = vadd.f32 %v1897_v29, %v1889_v27  ;;  %v2915_v36 = vadd.f32 %v1897_v29, %v1890_v28  ;;  %v2918_v25 = vadd.f32 %v2874_v44, %v1731_v40 }
 0x2da   : > { %v2145_v37 = vmul.f32 -1.442695, %v2906_v30  ;;  %v2146_v34 = vmul.f32 -1.442695, %v2908_v31  ;;  %v2147_v38 = vmul.f32 -1.442695, %v2910_v32 }
 0x2db   : > { %2426 = vpow2.f32 %v2144_v33  ;;  %v2148_v43 = vmul.f32 -1.442695, %v2913_v35  ;;  %v2149_v45 = vmul.f32 -1.442695, %v2915_v36  ;;  %v2135_v0 = vmul.f32 -1.442695, %v2918_v25 }
 0x2dc   : > { %2428 = vpow2.f32 %v2145_v37  ;;  %v2136_v55 = vmul.f32 -1.442695, %v2926_v46 }
 0x2dd   : > { %2430 = vpow2.f32 %v2146_v34 }
 0x2de   : > { %2432 = vpow2.f32 %v2147_v38 }
 0x2df   : > { %v2419_v47 = vpop.eup %2418  ;;  %2434 = vpow2.f32 %v2148_v43 }
 0x2e0   : > { %v2421_v48 = vpop.eup %2420  ;;  %v1771_v49 = vadd.f32 1.0, %v2419_v47  ;;  %2436 = vpow2.f32 %v2149_v45 }
 0x2e1   : > { %v2423_v50 = vpop.eup %2422  ;;  %v1772_v54 = vadd.f32 1.0, %v2421_v48  ;;  %2438 = vpow2.f32 %v2135_v0 }
 0x2e2   : > { %v2425_v57 = vpop.eup %2424  ;;  %v1773_v56 = vadd.f32 1.0, %v2423_v50  ;;  %2440 = vrcp.f32 %v1771_v49 }
 0x2e3   : > { %2442 = vrcp.f32 %v1772_v54  ;;  %v1768_v58 = vadd.f32 1.0, %v2425_v57 }
 0x2e4   : > { %2444 = vrcp.f32 %v1773_v56 }
 0x2e5   : > { %v2427_v44 = vpop.eup %2426  ;;  %2446 = vpow2.f32 %v2136_v55 }
 0x2e6   : > { %v2429_v59 = vpop.eup %2428  ;;  %v1923_v61 = vadd.f32 1.0, %v2427_v44  ;;  %2448 = vrcp.f32 %v1768_v58 }
 0x2e7   : > { %v2431_v62 = vpop.eup %2430  ;;  %v1924_v2 = vadd.f32 1.0, %v2429_v59 }
 0x2e8   : > { %v2433_v51 = vpop.eup %2432  ;;  %v1925_v3 = vadd.f32 1.0, %v2431_v62  ;;  %2450 = vrcp.f32 %v1923_v61 }
 0x2e9   : > { %v2435_v52 = vpop.eup %2434  ;;  %2452 = vrcp.f32 %v1924_v2  ;;  %v1926_v4 = vadd.f32 1.0, %v2433_v51 }
 0x2ea   : > { %v2437_v12 = vpop.eup %2436  ;;  %2454 = vrcp.f32 %v1925_v3  ;;  %v1927_v41 = vadd.f32 1.0, %v2435_v52 }
 0x2eb   : > { %v2439_v16 = vpop.eup %2438  ;;  %v1928_v42 = vadd.f32 1.0, %v2437_v12  ;;  %2456 = vrcp.f32 %v1926_v4 }
 0x2ec   : > { %v2441_v6 = vpop.eup %2440  ;;  %2458 = vrcp.f32 %v1927_v41  ;;  %v1769_v7 = vadd.f32 1.0, %v2439_v16 }
 0x2ed   : > { %v2443_v23 = vpop.eup %2442  ;;  %v1789_v39 = vmul.f32 %v2441_v6, %v2886_v5  ;;  %2460 = vrcp.f32 %v1928_v42 }
 0x2ee   : > { %v2445_v40 = vpop.eup %2444  ;;  %v1790_v8 = vmul.f32 %v2443_v23, %v2888_v1  ;;  %2462 = vrcp.f32 %v1769_v7 }
 0x2ef   : > { %v2447_v60 = vpop.eup %2446  ;;  %v1791_v53 = vmul.f32 %v2445_v40, %v2890_v21 }
 0x2f0   : > { %v2159_v9 = vpack.c.bf16 %v1790_v8, %v1789_v39  ;;  %v1770_v10 = vadd.f32 1.0, %v2447_v60  ;;  %v2449_v11 = vpop.eup %2448 }
 0x2f1   : > { %v2160_v13 = vpack.c.bf16 %v1791_v53, %v1791_v53 }
 0x2f2   : > { %v2451_v5 = vpop.eup %2450  ;;  %1814 = vst [vmem:[%s2936_s27 + $0xc] sm:$0xff] %v2159_v9  ;;  %2464 = vrcp.f32 %v1770_v10 }
 0x2f3   : > { %v2453_v1 = vpop.eup %2452  ;;  %1815 = vst [vmem:[%s2936_s27 + $0x14] sm:$0xf] %v2160_v13  ;;  %v1941_v14 = vmul.f32 %v2451_v5, %v2904_v26  ;;  %v1786_v26 = vmul.f32 %v2449_v11, %v2893_v15 }
 0x2f4   : > { %v2455_v17 = vpop.eup %2454  ;;  %v1942_v18 = vmul.f32 %v2453_v1, %v2906_v30 }
 0x2f5   : > { %v2457_v19 = vpop.eup %2456  ;;  %v1943_v21 = vmul.f32 %v2455_v17, %v2908_v31 }
 0x2f6   : > { %v2459_v63 = vpop.eup %2458  ;;  %v2161_v24 = vpack.c.bf16 %v1942_v18, %v1941_v14  ;;  %v1944_v20 = vmul.f32 %v2457_v19, %v2910_v32 }
 0x2f7   : > { %v2461_v22 = vpop.eup %2460  ;;  %v2162_v27 = vpack.c.bf16 %v1943_v21, %v1943_v21  ;;  %v1945_v28 = vmul.f32 %v2459_v63, %v2913_v35 }
 0x2f8   : > { %v2463_v29 = vpop.eup %2462  ;;  %1967 = vst [vmem:[%s2936_s27 + $0x18] sm:$0xff] %v2161_v24  ;;  %v1946_v30 = vmul.f32 %v2461_v22, %v2915_v36 }
 0x2f9   : > { %1968 = vst [vmem:[%s2936_s27 + $0x20] sm:$0xf] %v2162_v27  ;;  %v2163_v33 = vpack.c.bf16 %v1945_v28, %v1944_v20  ;;  %v1787_v31 = vmul.f32 %v2463_v29, %v2918_v25 }
 0x2fa   : > { %v2164_v37 = vpack.c.bf16 %v1946_v30, %v1946_v30 }
 0x2fb   : > { %1969 = vst [vmem:[%s2936_s27 + $0x24] sm:$0xff] %v2163_v33  ;;  %v2157_v34 = vpack.c.bf16 %v1787_v31, %v1786_v26 }
 0x2fc   : > { %v2465_v32 = vpop.eup %2464  ;;  %1970 = vst [vmem:[%s2936_s27 + $0x2c] sm:$0xf] %v2164_v37 }
 0x2fd   : > { %v1788_v38 = vmul.f32 %v2465_v32, %v2926_v46  ;;  %1812 = vst [vmem:[%s2936_s27] sm:$0xff] %v2157_v34 }
 0x2ff   : > { %v2158_v35 = vpack.c.bf16 %v1788_v38, %v1788_v38 }
 0x301   : > { %1813 = vst [vmem:[%s2936_s27 + $0x8] sm:$0xf] %v2158_v35 }
 0x302 PF: > { %s13_s12 = sadd.s32 1, %s2472_s12  }
 0x303   : > { %p10_p4 = scmp.ge.s32.totalorder %s13_s12, 4  }
 0x305   :  { %12 = sbr.rel (!%p10_p4) target bundleno = 1 (0x1), region = 70 }

// kernel: encoder_forward.3
= control target key start
LH: loop header
LB: loop body
LE: loop exit
PB: predicated region body
PF: predicated region fallthrough
CT: control target
= control target key end

     0   :  { %s1701_s12 = smov 0   ;;  %s1892_s0 = inlined_call_operand.vmem [shape: bf16[2,4,32,138], index: 0, kind: input, shape index: {}]   ;;  %s1893_s1 = inlined_call_operand.vmem [shape: bf16[9,32,32], index: 1, kind: input, shape index: {}]   ;;  %s1894_s2 = inlined_call_operand.vmem [shape: f32[32,3], index: 2, kind: input, shape index: {}]   ;;  %s1895_s3 = inlined_call_operand.vmem [shape: bf16[2,32,128], index: 3, kind: output, shape index: {}]  }
   0x1 LB: > { %s1289_s13 = sadd.s32 4294967295, %s1673_s12   ;;  %p1293_p0 = scmp.ge.s32.totalorder %s1673_s12, 1  ;;  %s1673_s12 = sphi %s1701_s12, %s13_s12  }
   0x2   : > { %p137_p1 = scmp.lt.s32.totalorder %s1673_s12, 3 }
   0x4   : > { %p138_p2 = pnand %p1293_p0, %p137_p1 }
   0x5   : > { %p161_p3 = scmp.lt.s32.totalorder (!%p138_p2), %s1289_s13, 1  ;;  %vm212_vm0 = vcmask (!%p138_p2), 261120   ;;  %v1624_v0 = vld [vmem:[%s1893_s1 + $0x40] sm:$0xff] (!%p138_p2)   ;;  %v1627_v1 = vld [vmem:[%s1893_s1 + $0x10] sm:$0xff] (!%p138_p2)   ;;  %s1675_s22 = smov (!%p138_p2), 127   ;;  %v1626_v14 = vld [vmem:[%s1893_s1 + $0x48] sm:$0xff] (!%p138_p2)  }
   0x6   : > { %141 = sbr.rel (%p138_p2) target bundleno = 673 (0x2a1), region = 32  ;;  %1505 = vmatprep.mubr.msk.bf16.mxu0 (!%p138_p2), %vm212_vm0, %v1624_v0  ;;  %1473 = vmatprep.mubr.msk.bf16.mxu1 (!%p138_p2), %vm212_vm0, %v1627_v1  ;;  %s1676_s23 = smov (!%p138_p2), 119   ;;  %v1628_v15 = vld [vmem:[%s1893_s1 + $0x18] sm:$0xff] (!%p138_p2)   ;;  %v1630_v17 = vld [vmem:[%s1893_s1 + $0x50] sm:$0xff] (!%p138_p2)   ;;  %v1633_v19 = vld [vmem:[%s1893_s1] sm:$0xff] (!%p138_p2)   ;;  %v1678_v27 = vmov (!%p138_p2), 0  }
   0x7   : > { %v1634_v24 = vld [vmem:[%s1893_s1 + $0x8] sm:$0xff] (!%p138_p2)   ;;  %v1637_v25 = vld [vmem:[%s1893_s1 + $0x20] sm:$0xff] (!%p138_p2)   ;;  %s1677_s9 = smov (!%p138_p2), 118   ;;  %1598 = vset.pattern.permute.xlu1 (!%p138_p2), %v1678_v27  ;;  %1597 = vset.pattern.permute.xlu0 (!%p138_p2), %v1678_v27  ;;  %v1797_v29 = vld [vmem:[%s1894_s2 + $0x10] sm:$0xff] (!%p138_p2)  ;;  %vm388_vm1 = vcmask (!%p138_p2), 1039360   ;;  %vm763_vm2 = vcmask (!%p138_p2), 973824  }
   0x8   : > { %v1786_v26 = vld [vmem:[%s1894_s2 + $0x8] sm:$0xff] (!%p138_p2)  ;;  %v1791_v28 = vld [vmem:[%s1894_s2] sm:$0xff] (!%p138_p2)  ;;  %v1803_v30 = vld [vmem:[%s1894_s2 + $0x18] sm:$0xff] (!%p138_p2)  ;;  %vm956_vm3 = vcmask (!%p138_p2), 965632  }
   0x9   : > { %v1632_v41 = vld [vmem:[%s1893_s1 + $0x58] sm:$0xff] (!%p138_p2)   ;;  %v1635_v42 = vld [vmem:[%s1893_s1 + $0x60] sm:$0xff] (!%p138_p2)   ;;  %v1636_v52 = vld [vmem:[%s1893_s1 + $0x68] sm:$0xff] (!%p138_p2)  }
   0xa   : > { %v1640_v55 = vld [vmem:[%s1893_s1 + $0x70] sm:$0xff] (!%p138_p2)   ;;  %v1638_v57 = vld [vmem:[%s1893_s1 + $0x28] sm:$0xff] (!%p138_p2)  }
   0xb   : > { %v1643_v61 = vld [vmem:[%s1893_s1 + $0x30] sm:$0xff] (!%p138_p2)  }
   0xd   : > { %s1897_s13 = smov (!%p161_p3, %s1289_s13), 1 }
   0xe   : > { %s1416_s18 = sshll.u32 %s1897_s13, 7  ;;  %s1417_s19 = sshll.u32 %s1897_s13, 4 }
   0xf   : > { %s1722_s21 = scalar_lea.vmem %s1892_s0, %s1416_s18 }
  0x10   : > { %v1603_v2 = vld [vmem:[%s1722_s21 + $0x50] ss:$8 sps:$4 sm:$0xff]   ;;  %v1605_v3 = vld [vmem:[%s1722_s21 + $0x54] ss:$8 sps:$4 sm:$0xff]   ;;  %v1606_v4 = vld [vmem:[%s1722_s21 + $0x40] ss:$8 sps:$4 sm:$0xff]  }
  0x11   : > { %673 = vrot.lane.b32.xlu1 %v1603_v2, %s1675_s22  ;;  %v1608_v5 = vld [vmem:[%s1722_s21 + $0x44] ss:$8 sps:$4 sm:$0xff]   ;;  %669 = vrot.lane.b32.xlu0 %v1606_v4, %s1675_s22  ;;  %v1611_v7 = vld [vmem:[%s1722_s21] ss:$8 sps:$4 sm:$0xff]  }
  0x12   : > { %v1609_v6 = vld [vmem:[%s1722_s21 + $0x4] ss:$8 sps:$4 sm:$0xff]   ;;  %v1612_v8 = vld [vmem:[%s1722_s21 + $0x14] ss:$8 sps:$4 sm:$0xff]   ;;  %v1621_v9 = vld [vmem:[%s1722_s21 + $0x60] ss:$8 sps:$4 sm:$0xff]  }
  0x13   : > { %v1622_v10 = vld [vmem:[%s1722_s21 + $0x20] ss:$8 sps:$4 sm:$0xff]   ;;  %1501 = vmatprep.subr.bf16.mxu0 %v1621_v9  ;;  %v1623_v11 = vld [vmem:[%s1722_s21 + $0x70] ss:$8 sps:$4 sm:$0xff]   ;;  %v1615_v18 = vld [vmem:[%s1722_s21 + $0x24] ss:$8 sps:$4 sm:$0xff]  }
  0x14   : > { %1502 = vmatpush3.bf16.msra.mxu0 %v1621_v9  ;;  %1469 = vmatprep.subr.bf16.mxu1 %v1622_v10  ;;  %v1625_v12 = vld [vmem:[%s1722_s21 + $0x30] ss:$8 sps:$4 sm:$0xff]   ;;  %v1629_v16 = vld [vmem:[%s1722_s21] ss:$8 sps:$4 sm:$0xff]   ;;  %v1618_v22 = vld [vmem:[%s1722_s21 + $0x34] ss:$8 sps:$4 sm:$0xff]  }
  0x15   : > { %675 = vrot.lane.b32.xlu1 %v1605_v3, %s1675_s22  ;;  %671 = vrot.lane.b32.xlu0 %v1608_v5, %s1675_s22  ;;  %v1614_v13 = vld [vmem:[%s1722_s21 + $0x10] ss:$8 sps:$4 sm:$0xff]   ;;  %v1617_v21 = vld [vmem:[%s1722_s21 + $0x20] ss:$8 sps:$4 sm:$0xff]   ;;  %v1679_v9 = vmov 1  }
  0x16   : > { %1503 = vmatprep.subr.bf16.mxu0 %v1623_v11  ;;  %1470 = vmatpush3.bf16.msra.mxu1 %v1622_v10  ;;  %v1631_v20 = vld [vmem:[%s1722_s21 + $0x10] ss:$8 sps:$4 sm:$0xff]   ;;  %v1639_v54 = vld [vmem:[%s1722_s21 + $0x40] ss:$8 sps:$4 sm:$0xff]   ;;  %v1048_v10 = vlaneseq }
  0x17   : > { %1471 = vmatprep.subr.bf16.mxu1 %v1625_v12  ;;  %v1620_v23 = vld [vmem:[%s1722_s21 + $0x30] ss:$8 sps:$4 sm:$0xff]   ;;  %v1645_v4 = vld [vmem:[%s1893_s1 + $0x80] sm:$0xff]  }
  0x18   : > { %1504 = vmatpush3.bf16.msra.mxu0 %v1623_v11  ;;  %v1641_v60 = vld [vmem:[%s1722_s21 + $0x50] ss:$8 sps:$4 sm:$0xff]   ;;  %v1049_v11 = vand.u32 127, %v1048_v10 }
  0x19   : > { %757 = vrot.lane.b32.xlu1 %v1609_v6, %s1676_s23  ;;  %755 = vrot.lane.b32.xlu0 %v1611_v7, %s1676_s23  ;;  %v1642_v2 = vld [vmem:[%s1893_s1 + $0x78] sm:$0xff]  }
  0x1a   : > { %1472 = vmatpush3.bf16.msra.mxu1 %v1625_v12  ;;  %vm1050_vm7 = vcmp.lt.s32.totalorder %v1049_v11, 72 }
  0x1b   : > { %1506 = vmatmul.mubr.msk.bf16.vlgmr.msra.gmra.mrb[0].mxu0 %vm212_vm0, %v1626_v14  ;;  %1477 = vmatprep.subr.bf16.mxu1 %v1629_v16 }
  0x1c   : > { %1513 = vmatprep.mubr.msk.bf16.mxu0 %vm212_vm0, %v1630_v17 }
  0x1d   : > { %761 = vrot.lane.b32.xlu1 %v1612_v8, %s1676_s23  ;;  %759 = vrot.lane.b32.xlu0 %v1614_v13, %s1676_s23 }
  0x1e   : > { %1474 = vmatmul.mubr.msk.bf16.vlgmr.msra.gmra.mrb[0].mxu1 %vm212_vm0, %v1628_v15 }
  0x1f   : > { %1478 = vmatpush3.bf16.msra.mxu1 %v1629_v16  ;;  %1481 = vmatprep.mubr.msk.bf16.mxu1 %vm212_vm0, %v1633_v19 }
  0x20   : > { %1479 = vmatprep.subr.bf16.mxu1 %v1631_v20 }
  0x21   : > { %382 = vrot.lane.b32.xlu1 %v1609_v6, %s1675_s22  ;;  %380 = vrot.lane.b32.xlu0 %v1611_v7, %s1675_s22 }
  0x23   : > { %1480 = vmatpush3.bf16.msra.mxu1 %v1631_v20 }
  0x25   : > { %864 = vrot.lane.b32.xlu1 %v1615_v18, %s1676_s23  ;;  %862 = vrot.lane.b32.xlu0 %v1617_v21, %s1676_s23 }
  0x29   : > { %386 = vrot.lane.b32.xlu1 %v1612_v8, %s1675_s22  ;;  %384 = vrot.lane.b32.xlu0 %v1614_v13, %s1675_s22 }
  0x2a   : > { %1482 = vmatmul.mubr.msk.bf16.vlgmr.msra.gmra.mrb[0].mxu1 %vm212_vm0, %v1634_v24 }
  0x2b   : > { %1489 = vmatprep.mubr.msk.bf16.mxu1 %vm212_vm0, %v1637_v25 }
  0x2d   : > { %868 = vrot.lane.b32.xlu1 %v1618_v22, %s1676_s23  ;;  %866 = vrot.lane.b32.xlu0 %v1620_v23, %s1676_s23  ;;  %s170_s23 = scalar_lea.vmem %s1895_s3, %s1417_s19 }
  0x31   : > { %950 = vrot.lane.b32.xlu1 %v1609_v6, %s1677_s9  ;;  %948 = vrot.lane.b32.xlu0 %v1611_v7, %s1677_s9  ;;  %v1644_v7 = vld [vmem:[%s1893_s1 + $0x38] sm:$0xff]  }
  0x35   : > { %954 = vrot.lane.b32.xlu1 %v1612_v8, %s1677_s9  ;;  %952 = vrot.lane.b32.xlu0 %v1614_v13, %s1677_s9  ;;  %v1646_v8 = vld [vmem:[%s1893_s1 + $0x88] sm:$0xff]   ;;  %v1857_v12 = vmul.u32.u64.low 3817748708, %v1049_v11  ;;  %v1858_v13 = vmul.u32.u64.high 3817748708, %v1049_v11, %v1857_v12 }
  0x37   : > { %v1057_v14 = vshrl.u32 %v1858_v13, 3 }
  0x39   : > { %1031 = vperm.xlu1 %1598, %v1786_v26   ;;  %1026 = vperm.xlu0 %1597, %v1791_v28   ;;  %v1058_v15 = vmul.u32 9, %v1057_v14 }
  0x3b   : > { %v1059_v16 = vsub.s32 %v1049_v11, %v1058_v15 }
  0x3d   : > { %1036 = vperm.xlu1 %1598, %v1797_v29   ;;  %1041 = vperm.xlu0 %1597, %v1803_v30   ;;  %vm1062_vm4 = vcmp.ne.s32.totalorder %v1059_v16, 0  ;;  %vm1063_vm5 = vcmp.lt.s32.totalorder %v1059_v16, 0  ;;  %v1065_v19 = vadd.s32 9, %v1059_v16 }
  0x3e   : > { %vm1064_vm6 = vmand %vm1063_vm5, %vm1062_vm4 }
  0x3f   : > { %v1066_v24 = vsel %vm1064_vm6, %v1065_v19, %v1059_v16 }
  0x40   : > { %vm1067_vm8 = vcmp.lt.s32.totalorder %v1066_v24, 8 }
  0x41   : > { %1600 = vset.pattern.permute.xlu1 %v1679_v9  ;;  %1599 = vset.pattern.permute.xlu0 %v1679_v9  ;;  %vm1068_vm9 = vmand %vm1050_vm7, %vm1067_vm8 }
  0x83   : > { %v674_v31 = vpop.permute.xlu1 %673  ;;  %v670_v32 = vpop.permute.xlu0 %669 }
  0x87   : > { %v676_v33 = vpop.permute.xlu1 %675  ;;  %v672_v34 = vpop.permute.xlu0 %671 }
  0x88   : > { %v677_v35 = vsel %vm388_vm1, %v670_v32, %v672_v34  ;;  %v678_v37 = vsel %vm388_vm1, %v674_v31, %v676_v33 }
  0x89   : > { %1509 = vmatprep.subr.bf16.mxu0 %v677_v35 }
  0x8a   : > { %1510 = vmatpush3.bf16.msra.mxu0 %v677_v35 }
  0x8b   : > { %v758_v36 = vpop.permute.xlu1 %757  ;;  %1511 = vmatprep.subr.bf16.mxu0 %v678_v37  ;;  %v756_v38 = vpop.permute.xlu0 %755 }
  0x8c   : > { %v764_v39 = vsel %vm763_vm2, %v756_v38, %v758_v36 }
  0x8e   : > { %1512 = vmatpush3.bf16.msra.mxu0 %v678_v37 }
  0x8f   : > { %v762_v40 = vpop.permute.xlu1 %761  ;;  %v760_v43 = vpop.permute.xlu0 %759  ;;  %1517 = vmatprep.subr.bf16.mxu0 %v764_v39 }
  0x90   : > { %v765_v44 = vsel %vm763_vm2, %v760_v43, %v762_v40 }
  0x91   : > { %1514 = vmatmul.mubr.msk.bf16.vlgmr.msra.gmra.mrb[0].mxu0 %vm212_vm0, %v1632_v41 }
  0x92   : > { %1518 = vmatpush3.bf16.msra.mxu0 %v764_v39  ;;  %1521 = vmatprep.mubr.msk.bf16.mxu0 %vm212_vm0, %v1635_v42 }
  0x93   : > { %v383_v45 = vpop.permute.xlu1 %382  ;;  %v381_v46 = vpop.permute.xlu0 %380  ;;  %1519 = vmatprep.subr.bf16.mxu0 %v765_v44 }
  0x94   : > { %v389_v47 = vsel %vm388_vm1, %v381_v46, %v383_v45 }
  0x95   : > { %1485 = vmatprep.subr.bf16.mxu1 %v389_v47 }
  0x96   : > { %1520 = vmatpush3.bf16.msra.mxu0 %v765_v44  ;;  %1486 = vmatpush3.bf16.msra.mxu1 %v389_v47 }
  0x97   : > { %v865_v48 = vpop.permute.xlu1 %864  ;;  %v863_v49 = vpop.permute.xlu0 %862 }
  0x98   : > { %v870_v50 = vsel %vm763_vm2, %v863_v49, %v865_v48 }
  0x99   : > { %1525 = vmatprep.subr.bf16.mxu0 %v870_v50 }
  0x9b   : > { %v387_v51 = vpop.permute.xlu1 %386  ;;  %v385_v53 = vpop.permute.xlu0 %384 }
  0x9c   : > { %v390_v56 = vsel %vm388_vm1, %v385_v53, %v387_v51 }
  0x9d   : > { %1487 = vmatprep.subr.bf16.mxu1 %v390_v56  ;;  %1522 = vmatmul.mubr.msk.bf16.vlgmr.msra.gmra.mrb[0].mxu0 %vm212_vm0, %v1636_v52 }
  0x9e   : > { %1488 = vmatpush3.bf16.msra.mxu1 %v390_v56  ;;  %1526 = vmatpush3.bf16.msra.mxu0 %v870_v50 }
  0x9f   : > { %v869_v58 = vpop.permute.xlu1 %868  ;;  %v867_v59 = vpop.permute.xlu0 %866  ;;  %1493 = vmatprep.subr.bf16.mxu1 %v1639_v54  ;;  %1529 = vmatprep.mubr.msk.bf16.mxu0 %vm212_vm0, %v1640_v55  ;;  %v1680_v55 = vmov 2  }
  0xa0   : > { %v871_v62 = vsel %vm763_vm2, %v867_v59, %v869_v58 }
  0xa1   : > { %1490 = vmatmul.mubr.msk.bf16.vlgmr.msra.gmra.mrb[0].mxu1 %vm212_vm0, %v1638_v57  ;;  %1527 = vmatprep.subr.bf16.mxu0 %v871_v62 }
  0xa2   : > { %1494 = vmatpush3.bf16.msra.mxu1 %v1639_v54  ;;  %1528 = vmatpush3.bf16.msra.mxu0 %v871_v62 }
  0xa3   : > { %v951_v63 = vpop.permute.xlu1 %950  ;;  %1495 = vmatprep.subr.bf16.mxu1 %v1641_v60  ;;  %v949_v0 = vpop.permute.xlu0 %948  ;;  %1497 = vmatprep.mubr.msk.bf16.mxu1 %vm212_vm0, %v1643_v61 }
  0xa4   : > { %v957_v1 = vsel %vm956_vm3, %v949_v0, %v951_v63 }
  0xa5   : > { %1533 = vmatprep.subr.bf16.mxu0 %v957_v1 }
  0xa6   : > { %1496 = vmatpush3.bf16.msra.mxu1 %v1641_v60 }
  0xa7   : > { %v955_v3 = vpop.permute.xlu1 %954  ;;  %v953_v5 = vpop.permute.xlu0 %952 }
  0xa8   : > { %v958_v6 = vsel %vm956_vm3, %v953_v5, %v955_v3 }
  0xa9   : > { %1530 = vmatmul.mubr.msk.bf16.vlgmr.msra.gmra.mrb[0].mxu0 %vm212_vm0, %v1642_v2 }
  0xaa   : > { %1534 = vmatpush3.bf16.msra.mxu0 %v957_v1  ;;  %1537 = vmatprep.mubr.msk.bf16.mxu0 %vm212_vm0, %v1645_v4 }
  0xab   : > { %1535 = vmatprep.subr.bf16.mxu0 %v958_v6 }
  0xad   : > { %1498 = vmatmul.mubr.msk.bf16.vlgmr.msra.gmra.mrb[0].mxu1 %vm212_vm0, %v1644_v7 }
  0xae   : > { %1536 = vmatpush3.bf16.msra.mxu0 %v958_v6 }
  0xb5   : > { %1538 = vmatmul.mubr.msk.bf16.vlgmr.msra.gmra.mrb[0].mxu0 %vm212_vm0, %v1646_v8 }
  0xb8   : > { %v1032_v22 = vpop.permute.xlu1 %1031  ;;  %v1027_v23 = vpop.permute.xlu0 %1026 }
  0xbc   : > { %v1037_v32 = vpop.permute.xlu1 %1036  ;;  %v1042_v35 = vpop.permute.xlu0 %1041 }
 0x180   : > { %v1499_v17 = vpop.f32.mrb[0].mxu1 }
 0x181   : > { %v524_v18 = vpop.f32.mrb[1].mxu1 }
 0x182   : > { %v1500_v20 = vpop.f32.mrb[2].mxu1 }
 0x183   : > { %v527_v21 = vpop.f32.mrb[3].mxu1 }
 0x188   : > { %v1539_v25 = vpop.f32.mrb[0].mxu0 }
 0x189   : > { %v1541_v27 = vadd.f32 %v1539_v25, %v1499_v17  ;;  %v1001_v31 = vpop.f32.mrb[1].mxu0 }
 0x18a   : > { %v1542_v33 = vadd.f32 %v1001_v31, %v524_v18  ;;  %v1540_v34 = vpop.f32.mrb[2].mxu0 }
 0x18b   : > { %v1543_v36 = vadd.f32 %v1540_v34, %v1500_v20  ;;  %v1004_v37 = vpop.f32.mrb[3].mxu0  ;;  %v1863_v39 = vadd.f32 %v1541_v27, %v1037_v32 }
 0x18c   : > { %v1861_v38 = vadd.f32 %v1542_v33, %v1027_v23  ;;  %v1544_v40 = vadd.f32 %v1004_v37, %v527_v21 }
 0x18d   : > { %v1865_v41 = vadd.f32 %v1543_v36, %v1042_v35  ;;  %v1153_v45 = vsel %vm1068_vm9, %v1863_v39, 0.0 }
 0x18e   : > { %v1867_v42 = vadd.f32 %v1544_v40, %v1032_v22  ;;  %v1071_v43 = vsel %vm1068_vm9, %v1861_v38, 0.0  ;;  %v1166_v52 = vmul.f32 %v1153_v45, %v1153_v45 }
 0x18f   : > { %v1154_v44 = vsel %vm1068_vm9, %v1865_v41, 0.0  ;;  %v1084_v48 = vmul.f32 %v1071_v43, %v1071_v43 }
 0x190   : > { %v1072_v46 = vsel %vm1068_vm9, %v1867_v42, 0.0  ;;  %v1167_v50 = vmul.f32 %v1154_v44, %v1154_v44  ;;  %v1155_v54 = vadd.f32 %v1154_v44, %v1153_v45 }
 0x191   : > { %v1073_v47 = vadd.f32 %v1072_v46, %v1071_v43  ;;  %v1085_v49 = vmul.f32 %v1072_v46, %v1072_v46 }
 0x192   : > { %v1168_v53 = vadd.f32 %v1167_v50, %v1166_v52 }
 0x193   : > { %1074 = vadd.xlane.f32.xlu1 %v1073_v47  ;;  %v1086_v51 = vadd.f32 %v1085_v49, %v1084_v48 }
 0x195   : > { %1087 = vadd.xlane.f32.xlu0 %v1086_v51 }
 0x197   : > { %1169 = vadd.xlane.f32.xlu1 %v1168_v53 }
 0x199   : > { %1156 = vadd.xlane.f32.xlu0 %v1155_v54 }
 0x1a8   : > { %1114 = vperm.xlu1 %1600, %v1786_v26  }
 0x1ac   : > { %1191 = vperm.xlu1 %1600, %v1797_v29  }
 0x1af   : > { %1110 = vperm.xlu0 %1599, %v1791_v28  }
 0x1b0   : > { %1195 = vperm.xlu1 %1600, %v1803_v30  }
 0x1b3   : > { %1602 = vset.pattern.permute.xlu0 %v1680_v55 }
 0x1b4   : > { %1601 = vset.pattern.permute.xlu1 %v1680_v55 }
 0x1b5   : > { %1120 = vperm.xlu1 %1601, %v1791_v28  }
 0x1b9   : > { %1124 = vperm.xlu1 %1601, %v1786_v26  }
 0x1bd   : > { %1201 = vperm.xlu1 %1601, %v1797_v29  }
 0x1c1   : > { %1205 = vperm.xlu1 %1601, %v1803_v30  }
 0x220   : > { %v1075_v56 = vpop.xlane.xlu1 %1074 }
 0x221   : > { %v1076_v57 = vrot.slane %v1075_v56, 4 }
 0x222   : > { %v1088_v58 = vpop.xlane.xlu0 %1087 }
 0x223   : > { %v1077_v59 = vadd.f32 %v1076_v57, %v1075_v56  ;;  %v1089_v60 = vrot.slane %v1088_v58, 4 }
 0x224   : > { %v1170_v61 = vpop.xlane.xlu1 %1169 }
 0x225   : > { %v1078_v62 = vrot.slane %v1077_v59, 2  ;;  %v1090_v63 = vadd.f32 %v1089_v60, %v1088_v58  ;;  %v1171_v0 = vrot.slane %v1170_v61, 4 }
 0x226   : > { %v1157_v1 = vpop.xlane.xlu0 %1156 }
 0x227   : > { %v1091_v2 = vrot.slane %v1090_v63, 2  ;;  %v1172_v3 = vadd.f32 %v1171_v0, %v1170_v61  ;;  %v1158_v4 = vrot.slane %v1157_v1, 4  ;;  %v1079_v28 = vadd.f32 %v1078_v62, %v1077_v59 }
 0x228   : > { %v1115_v16 = vpop.permute.xlu1 %1114 }
 0x229   : > { %v1173_v5 = vrot.slane %v1172_v3, 2  ;;  %v1159_v26 = vadd.f32 %v1158_v4, %v1157_v1  ;;  %v1080_v6 = vrot.slane %v1079_v28, 1  ;;  %v1092_v29 = vadd.f32 %v1091_v2, %v1090_v63 }
 0x22b   : > { %v1160_v7 = vrot.slane %v1159_v26, 2  ;;  %v1081_v30 = vadd.f32 %v1080_v6, %v1079_v28  ;;  %v1093_v8 = vrot.slane %v1092_v29, 1  ;;  %v1174_v9 = vadd.f32 %v1173_v5, %v1172_v3 }
 0x22c   : > { %v1192_v19 = vpop.permute.xlu1 %1191 }
 0x22d   : > { %1575 = vpush %v1081_v30  ;;  %v1094_v10 = vadd.f32 %v1093_v8, %v1092_v29  ;;  %v1161_v11 = vadd.f32 %v1160_v7, %v1159_v26  ;;  %v1175_v12 = vrot.slane %v1174_v9, 1 }
 0x22e   : > { %v1111_v48 = vpop.permute.xlu0 %1110 }
 0x22f   : > { %1577 = vpush %v1094_v10  ;;  %v1162_v13 = vrot.slane %v1161_v11, 1  ;;  %v1176_v15 = vadd.f32 %v1175_v12, %v1174_v9 }
 0x230   : > { %v1196_v32 = vpop.permute.xlu1 %1195 }
 0x231   : > { %v1163_v14 = vadd.f32 %v1162_v13, %v1161_v11 }
 0x233   : > { %1579 = vpush %v1163_v14 }
 0x234   : > { %1581 = vpush %v1176_v15  ;;  %v1121_v40 = vpop.permute.xlu1 %1120 }
 0x238   : > { %v1125_v44 = vpop.permute.xlu1 %1124 }
 0x23c   : > { %v1202_v53 = vpop.permute.xlu1 %1201 }
 0x240   : > { %v1206_v63 = vpop.permute.xlu1 %1205 }
 0x25e   : > { %s1576_s15 = spop %1575 }
 0x25f   : > { %v1083_v17 = vstv %s1576_s15 }
 0x260   : > { %v1098_v18 = vmul.f32 0.0009765625, %v1083_v17  ;;  %s1578_s16 = spop %1577 }
 0x261   : > { %v1096_v20 = vstv %s1578_s16 }
 0x262   : > { %v1099_v21 = vmul.f32 0.0009765625, %v1096_v20  ;;  %v1100_v22 = vmul.f32 %v1098_v18, %v1098_v18  ;;  %v1104_v45 = vsub.f32 %v1867_v42, %v1098_v18  ;;  %v1103_v46 = vsub.f32 %v1861_v38, %v1098_v18 }
 0x264   : > { %v1101_v23 = vsub.f32 %v1099_v21, %v1100_v22  ;;  %s1580_s17 = spop %1579 }
 0x265   : > { %v1165_v24 = vstv %s1580_s17  ;;  %s1582_s18 = spop %1581 }
 0x266   : > { %v1102_v25 = vmax.f32 %v1101_v23, 0.0  ;;  %v1179_v27 = vmul.f32 0.0009765625, %v1165_v24  ;;  %v1178_v31 = vstv %s1582_s18 }
 0x267   : > { %v1180_v34 = vmul.f32 0.0009765625, %v1178_v31 }
 0x268   : > { %v1105_v33 = vadd.f32 1e-05, %v1102_v25  ;;  %v1181_v35 = vmul.f32 %v1179_v27, %v1179_v27  ;;  %v1184_v54 = vsub.f32 %v1863_v39, %v1179_v27  ;;  %v1185_v55 = vsub.f32 %v1865_v41, %v1179_v27 }
 0x26a   : > { %1647 = vrsqrt.f32 %v1105_v33  ;;  %v1182_v36 = vsub.f32 %v1180_v34, %v1181_v35 }
 0x26c   : > { %v1183_v37 = vmax.f32 %v1182_v36, 0.0 }
 0x26e   : > { %v1186_v43 = vadd.f32 1e-05, %v1183_v37 }
 0x270   : > { %1649 = vrsqrt.f32 %v1186_v43 }
 0x274   : > { %v1648_v47 = vpop.eup %1647 }
 0x275   : > { %v1108_v49 = vmul.f32 %v1648_v47, %v1104_v45  ;;  %v1107_v50 = vmul.f32 %v1648_v47, %v1103_v46 }
 0x277   : > { %v1118_v51 = vmul.f32 %v1115_v16, %v1108_v49  ;;  %v1117_v52 = vmul.f32 %v1111_v48, %v1107_v50 }
 0x279   : > { %v1128_v56 = vadd.f32 %v1125_v44, %v1118_v51  ;;  %v1127_v57 = vadd.f32 %v1121_v40, %v1117_v52 }
 0x27a   : > { %v1650_v58 = vpop.eup %1649 }
 0x27b   : > { %v1189_v59 = vmul.f32 %v1650_v58, %v1185_v55  ;;  %v1407_v60 = vmul.f32 -1.442695, %v1128_v56  ;;  %v1188_v61 = vmul.f32 %v1650_v58, %v1184_v54  ;;  %v1406_v42 = vmul.f32 -1.442695, %v1127_v57 }
 0x27d   : > { %v1199_v62 = vmul.f32 %v1196_v32, %v1189_v59  ;;  %1651 = vpow2.f32 %v1407_v60  ;;  %v1198_v38 = vmul.f32 %v1192_v19, %v1188_v61 }
 0x27e   : > { %1653 = vpow2.f32 %v1406_v42 }
 0x27f   : > { %v1208_v0 = vadd.f32 %v1202_v53, %v1198_v38  ;;  %v1209_v1 = vadd.f32 %v1206_v63, %v1199_v62 }
 0x281   : > { %v1410_v2 = vmul.f32 -1.442695, %v1208_v0  ;;  %v1411_v3 = vmul.f32 -1.442695, %v1209_v1 }
 0x283   : > { %1655 = vpow2.f32 %v1410_v2 }
 0x284   : > { %1657 = vpow2.f32 %v1411_v3 }
 0x287   : > { %v1652_v39 = vpop.eup %1651 }
 0x288   : > { %v1654_v41 = vpop.eup %1653  ;;  %v1136_v4 = vadd.f32 1.0, %v1652_v39 }
 0x289   : > { %v1135_v28 = vadd.f32 1.0, %v1654_v41 }
 0x28a   : > { %1659 = vrcp.f32 %v1136_v4 }
 0x28b   : > { %1661 = vrcp.f32 %v1135_v28 }
 0x28d   : > { %v1656_v5 = vpop.eup %1655 }
 0x28e   : > { %v1658_v26 = vpop.eup %1657  ;;  %v1216_v6 = vadd.f32 1.0, %v1656_v5 }
 0x28f   : > { %v1217_v29 = vadd.f32 1.0, %v1658_v26 }
 0x290   : > { %1663 = vrcp.f32 %v1216_v6 }
 0x291   : > { %1665 = vrcp.f32 %v1217_v29 }
 0x294   : > { %v1660_v7 = vpop.eup %1659 }
 0x295   : > { %v1662_v30 = vpop.eup %1661  ;;  %v1142_v8 = vmul.f32 %v1660_v7, %v1128_v56 }
 0x296   : > { %v1141_v9 = vmul.f32 %v1662_v30, %v1127_v57 }
 0x298   : > { %v1425_v10 = vpack.c.bf16 %v1142_v8, %v1141_v9 }
 0x29a   : > { %v1664_v11 = vpop.eup %1663  ;;  %1426 = vst [vmem:[%s170_s23] sm:$0xff] %v1425_v10  }
 0x29b   : > { %v1666_v12 = vpop.eup %1665  ;;  %v1222_v13 = vmul.f32 %v1664_v11, %v1208_v0 }
 0x29c   : > { %v1223_v14 = vmul.f32 %v1666_v12, %v1209_v1 }
 0x29e   : > { %v1430_v15 = vpack.c.bf16 %v1223_v14, %v1222_v13 }
 0x2a0   : > { %1432 = vst [vmem:[%s170_s23 + $0x8] sm:$0xff] %v1430_v15  }
 0x2a1 PF: > { %s13_s12 = sadd.s32 1, %s1673_s12  }
 0x2a2   : > { %p10_p4 = scmp.ge.s32.totalorder %s13_s12, 4  }
 0x2a4   :  { %12 = sbr.rel (!%p10_p4) target bundleno = 1 (0x1), region = 73 }

</bundles_post_ra>
